<compile_context>
chip_gen: v5e
topology: v5e:2x2
jax: 0.10.0
libtpu: 0.0.40
codegen_flags: <defaults>
</compile_context>

<pallas_src>
import functools

import jax
import jax.numpy as jnp
from jax import lax
from jax.experimental import pallas as pl
from jax.experimental.pallas import tpu as pltpu

EPS = 1e-5
NEG_INF = -1e30


# ----------------------------------------------------------------------------
# Kernel
# ----------------------------------------------------------------------------
def _layernorm(h, w, b):
    mu = jnp.mean(h, axis=-1, keepdims=True)
    d = h - mu
    var = jnp.mean(d * d, axis=-1, keepdims=True)
    return d * lax.rsqrt(var + EPS) * w + b


def _vision_tower_kernel(x_ref, pw_ref, pos_ref,
                         ln1w_ref, ln1b_ref, wqkv_ref, bqkv_ref,
                         wo_ref, bo_ref, ln2w_ref, ln2b_ref,
                         w1_ref, b1_ref, w2_ref, b2_ref,
                         o_ref, *, tb, s_pad, s_real, hidden):
    """One (image-block, layer) grid step.

    grid = (num_image_blocks, num_layers); the layer axis ('arbitrary')
    streams one layer's weights per step; the image-block axis is 'parallel'.
    The residual stream is carried in the resident output block o_ref (same
    block index across the layer axis), so activations stay in VMEM.

    x_ref  : (TB*S_pad, Cpp) bf16 flattened patch pixels (CLS/pad rows zero)
    pw_ref : (Cpp, D)        bf16 patch-embedding weight
    pos_ref: (S_pad, D)      f32 token/pos table (CLS token + patch bias folded)
    per-layer refs carry a leading block dim of 1 (layer `l` of the stack)
    o_ref  : (TB*S_pad, D)   f32 residual stream / final output
    """
    D = hidden
    l = pl.program_id(1)

    # ---- layer-0 prologue: patch embedding + token/positional table ---------
    @pl.when(l == 0)
    def _():
        emb = jnp.dot(x_ref[...], pw_ref[...],
                      preferred_element_type=jnp.float32)            # (M, D)
        emb = emb.reshape(tb, s_pad, D) + pos_ref[...]               # bcast imgs
        o_ref[...] = emb.reshape(tb * s_pad, D)

    x = o_ref[...]                                                   # (M, D) f32

    # ---- self-attention (pre-LN, single head, 1/sqrt(D) folded into Wq) -----
    h = _layernorm(x, ln1w_ref[0], ln1b_ref[0])
    hb = h.astype(jnp.bfloat16)
    # Three separate Q/K/V dots: D may not be a multiple of 128, so slicing a
    # fused (M, 3D) result along the lane axis would force relayout copies.
    q = jnp.dot(hb, wqkv_ref[0, 0], preferred_element_type=jnp.float32) + bqkv_ref[0, 0]
    k = jnp.dot(hb, wqkv_ref[0, 1], preferred_element_type=jnp.float32) + bqkv_ref[0, 1]
    v = jnp.dot(hb, wqkv_ref[0, 2], preferred_element_type=jnp.float32) + bqkv_ref[0, 2]

    # Batched scores/context: regroup rows as (TB, S_pad, D) on the 8-sublane
    # boundary (S_pad is padded to a multiple of 8).
    q3 = q.reshape(tb, s_pad, D).astype(jnp.bfloat16)
    k3 = k.reshape(tb, s_pad, D).astype(jnp.bfloat16)
    v3 = v.reshape(tb, s_pad, D).astype(jnp.bfloat16)
    scores = jnp.einsum('bqd,bkd->bqk', q3, k3,
                        preferred_element_type=jnp.float32)          # (TB,S,S)
    key_idx = lax.broadcasted_iota(jnp.int32, scores.shape, 2)
    scores = jnp.where(key_idx < s_real, scores, NEG_INF)            # mask pads
    scores = scores - jnp.max(scores, axis=-1, keepdims=True)
    p = jnp.exp(scores)
    p = p * pl.reciprocal(jnp.sum(p, axis=-1, keepdims=True), approx=True)
    ctx = jnp.einsum('bqk,bkd->bqd', p.astype(jnp.bfloat16), v3,
                     preferred_element_type=jnp.float32)             # (TB,S,D)
    attn = jnp.dot(ctx.reshape(tb * s_pad, D).astype(jnp.bfloat16), wo_ref[0],
                   preferred_element_type=jnp.float32) + bo_ref[0]
    x = x + attn

    # ---- MLP (pre-LN) --------------------------------------------------------
    h = _layernorm(x, ln2w_ref[0], ln2b_ref[0])
    h = jnp.dot(h.astype(jnp.bfloat16), w1_ref[0],
                preferred_element_type=jnp.float32) + b1_ref[0]
    h = jax.nn.gelu(h, approximate=True)
    h = jnp.dot(h.astype(jnp.bfloat16), w2_ref[0],
                preferred_element_type=jnp.float32) + b2_ref[0]

    o_ref[...] = x + h                                               # residual


# ----------------------------------------------------------------------------
# Wrapper (pallas_call plumbing)
# ----------------------------------------------------------------------------
def _resident_spec(arr):
    nd = arr.ndim
    return pl.BlockSpec(arr.shape, lambda b, l, _nd=nd: (0,) * _nd)


def _per_layer_spec(arr):
    nd = arr.ndim
    return pl.BlockSpec((1,) + arr.shape[1:],
                        lambda b, l, _nd=nd: (l,) + (0,) * (_nd - 1))


def vision_tower_forward(patches, params, *, num_layers, hidden, seq_real,
                         block_images=None):
    """patches: (B, S_pad, Cpp) bf16 with CLS row + zero pad rows included."""
    B, s_pad, cpp = patches.shape
    D = hidden

    # Images per grid step: amortize per-step fixed cost, but keep >= 2 steps
    # on the 'parallel' axis so both v7x TensorCores get work when B >= 2.
    if block_images is None:
        tb = 1 if B <= 1 else int(min(8, pl.cdiv(B, 2)))
    else:
        tb = int(block_images)
    nb = int(pl.cdiv(B, tb))
    b_pad = nb * tb
    if b_pad != B:
        patches = jnp.concatenate(
            [patches, jnp.zeros((b_pad - B, s_pad, cpp), patches.dtype)], axis=0)
    x_flat = patches.reshape(b_pad * s_pad, cpp)
    rows = tb * s_pad

    resident = [params["patch_w"], params["tok_pos"]]
    layer_weights = [params[k] for k in
                     ("ln1_w", "ln1_b", "wqkv", "bqkv", "wo", "bo",
                      "ln2_w", "ln2_b", "w1", "b1", "w2", "b2")]

    in_specs = [pl.BlockSpec((rows, cpp), lambda b, l: (b, 0))]
    in_specs += [_resident_spec(w) for w in resident]
    in_specs += [_per_layer_spec(w) for w in layer_weights]

    kernel = functools.partial(_vision_tower_kernel, tb=tb, s_pad=s_pad,
                               s_real=seq_real, hidden=D)
    out_flat = pl.pallas_call(
        kernel,
        out_shape=jax.ShapeDtypeStruct((b_pad * s_pad, D), jnp.float32),
        grid=(nb, num_layers),
        in_specs=in_specs,
        out_specs=pl.BlockSpec((rows, D), lambda b, l: (b, 0)),
        compiler_params=pltpu.CompilerParams(
            dimension_semantics=("parallel", "arbitrary")),
    )(x_flat, *resident, *layer_weights)

    return out_flat.reshape(b_pad, s_pad, D)[:B, :seq_real]


def patchify(images, patch_size, seq_pad):
    """NCHW images -> (B, S_pad, C*p*p) bf16.

    Row 0 is an all-zero CLS row (CLS content lives in the token/pos table),
    rows beyond the real sequence are zero padding to a multiple of 8 rows.
    Flattened in (C, ph, pw) order to match a PyTorch conv weight (D, C, p, p).
    """
    B, C, H, W = images.shape
    p = patch_size
    x = images.reshape(B, C, H // p, p, W // p, p)
    x = x.transpose(0, 2, 4, 1, 3, 5)                   # B, H/p, W/p, C, ph, pw
    x = x.reshape(B, (H // p) * (W // p), C * p * p)
    cls_row = jnp.zeros((B, 1, x.shape[-1]), x.dtype)
    x = jnp.concatenate([cls_row, x], axis=1)           # (B, S, Cpp)
    pad = seq_pad - x.shape[1]
    if pad > 0:
        x = jnp.concatenate(
            [x, jnp.zeros((B, pad, x.shape[-1]), x.dtype)], axis=1)
    return x.astype(jnp.bfloat16)


# ----------------------------------------------------------------------------
# Bridge module (mirrors EncoderVisionTower forward semantics)
# ----------------------------------------------------------------------------
class EncoderVisionTowerPallas:
    def __init__(self, image_tower="synthetic-clip-vit", *, image_size=16,
                 patch_size=8, in_channels=3, hidden_size=128, num_layers=2,
                 mlp_ratio=4, select_feature="patch", seed=0):
        self.image_tower_name = image_tower
        self.select_feature = select_feature
        self.image_size = image_size
        self.patch_size = patch_size
        self.in_channels = in_channels
        self._hidden_size = hidden_size
        self.num_layers = num_layers
        self.mlp_hidden = mlp_ratio * hidden_size
        self.encoder_type = "clip"
        self.num_patches = (image_size // patch_size) ** 2
        self.seq_real = self.num_patches + 1
        self.seq_pad = ((self.seq_real + 7) // 8) * 8    # sublane-align tokens
        self.is_loaded = False
        self._init_params(seed)
        self.is_loaded = True

    # deterministic synthetic "checkpoint"
    def _init_params(self, seed):
        D = self._hidden_size
        P = self.num_patches
        cpp = self.in_channels * self.patch_size * self.patch_size
        M = self.mlp_hidden
        L = self.num_layers
        key = jax.random.PRNGKey(seed)

        def nrm(k, shape, scale=0.02):
            return (scale * jax.random.normal(k, shape)).astype(jnp.float32)

        keys = jax.random.split(key, 4 + L)
        patch_w = nrm(keys[0], (cpp, D))
        patch_b = jnp.zeros((D,), jnp.float32)
        cls_tok = nrm(keys[1], (D,))
        pos_emb = nrm(keys[2], (P + 1, D))

        # Constant folds at init: CLS token and patch-embedding bias merged
        # into a single token/positional table; padded rows are zero.
        tok_pos = jnp.zeros((self.seq_pad, D), jnp.float32)
        tok_pos = tok_pos.at[0].set(cls_tok + pos_emb[0])
        tok_pos = tok_pos.at[1:P + 1].set(pos_emb[1:] + patch_b)

        scale = 1.0 / float(D) ** 0.5
        ln1_w, ln1_b, wqkv, bqkv = [], [], [], []
        wo, bo, ln2_w, ln2_b = [], [], [], []
        w1, b1, w2, b2 = [], [], [], []
        for li in range(L):
            lk = jax.random.split(keys[4 + li], 8)
            wq = nrm(lk[0], (D, D))
            wk = nrm(lk[1], (D, D))
            wv = nrm(lk[2], (D, D))
            bq = jnp.zeros((1, D), jnp.float32)
            bk = jnp.zeros((1, D), jnp.float32)
            bv = jnp.zeros((1, D), jnp.float32)
            # fold attention 1/sqrt(D) scale into the Q projection
            wqkv.append(jnp.stack([wq * scale, wk, wv], axis=0))   # (3, D, D)
            bqkv.append(jnp.stack([bq * scale, bk, bv], axis=0))   # (3, 1, D)
            ln1_w.append(jnp.ones((1, D), jnp.float32))
            ln1_b.append(jnp.zeros((1, D), jnp.float32))
            wo.append(nrm(lk[3], (D, D)))
            bo.append(jnp.zeros((1, D), jnp.float32))
            ln2_w.append(jnp.ones((1, D), jnp.float32))
            ln2_b.append(jnp.zeros((1, D), jnp.float32))
            w1.append(nrm(lk[4], (D, M)))
            b1.append(jnp.zeros((1, M), jnp.float32))
            w2.append(nrm(lk[5], (M, D)))
            b2.append(jnp.zeros((1, D), jnp.float32))

        stack = lambda xs: jnp.stack(xs, axis=0)
        bf16 = lambda x: x.astype(jnp.bfloat16)          # MXU operands in bf16
        self.params = dict(
            patch_w=bf16(patch_w),
            tok_pos=tok_pos.astype(jnp.float32),
            ln1_w=stack(ln1_w), ln1_b=stack(ln1_b),
            wqkv=bf16(stack(wqkv)), bqkv=stack(bqkv),
            wo=bf16(stack(wo)), bo=stack(bo),
            ln2_w=stack(ln2_w), ln2_b=stack(ln2_b),
            w1=bf16(stack(w1)), b1=stack(b1),
            w2=bf16(stack(w2)), b2=stack(b2),
        )

    @property
    def hidden_size(self):
        return self._hidden_size

    @property
    def dummy_feature(self):
        return jnp.zeros((1, self._hidden_size), jnp.float32)

    def feature_select(self, image_features):
        if self.select_feature == "patch":
            if image_features.shape[1] > 1:
                return image_features[:, 1:]
            return image_features
        elif self.select_feature == "cls_patch":
            return image_features
        elif self.select_feature == "cls":
            return image_features[:, 0:1]
        raise ValueError(f"Unexpected select feature: {self.select_feature}")

    def encode(self, images):
        patches = patchify(images, self.patch_size, self.seq_pad)
        return vision_tower_forward(
            patches, self.params, num_layers=self.num_layers,
            hidden=self._hidden_size, seq_real=self.seq_real)

    def __call__(self, images):
        # mirror forward(): accepts a list of images or a batched tensor
        if isinstance(images, (list, tuple)):
            images = jnp.stack(list(images), axis=0)
        result = self.encode(images)
        return self.feature_select(result)


# ----------------------------------------------------------------------------
# Pure-JAX f32 reference (sanity check only)
# ----------------------------------------------------------------------------
def _reference_forward(tower, images):
    p = tower.params
    f32 = lambda a: jnp.asarray(a, jnp.float32)
    S = tower.seq_real
    patches = f32(patchify(images, tower.patch_size, tower.seq_pad))[:, :S]
    x = patches @ f32(p["patch_w"]) + p["tok_pos"][:S]
    for li in range(tower.num_layers):
        h = _layernorm(x, p["ln1_w"][li], p["ln1_b"][li])
        q = h @ f32(p["wqkv"][li, 0]) + p["bqkv"][li, 0]
        k = h @ f32(p["wqkv"][li, 1]) + p["bqkv"][li, 1]
        v = h @ f32(p["wqkv"][li, 2]) + p["bqkv"][li, 2]
        s = jnp.einsum('bqd,bkd->bqk', q, k)
        prob = jax.nn.softmax(s, axis=-1)
        ctx = jnp.einsum('bqk,bkd->bqd', prob, v)
        x = x + ctx @ f32(p["wo"][li]) + p["bo"][li]
        h = _layernorm(x, p["ln2_w"][li], p["ln2_b"][li])
        h = jax.nn.gelu(h @ f32(p["w1"][li]) + p["b1"][li], approximate=True)
        x = x + h @ f32(p["w2"][li]) + p["b2"][li]
    return x


# ----------------------------------------------------------------------------
if __name__ == "__main__":
    tower = EncoderVisionTowerPallas(
        image_size=16, patch_size=8, in_channels=3,
        hidden_size=128, num_layers=2, select_feature="patch", seed=0)

    key = jax.random.PRNGKey(0)
    images = jax.random.normal(key, (4, 3, 16, 16), dtype=jnp.float32)  # NCHW

    feats = tower(images)                       # 'patch' -> (B, P, D)
    feats = jax.block_until_ready(feats)

    num_patches = (16 // 8) ** 2
    assert feats.shape == (4, num_patches, 128), feats.shape
    assert feats.dtype == jnp.float32
    assert bool(jnp.all(jnp.isfinite(feats)))

    # loose tolerance: bf16 MXU operands + approx reciprocal vs f32 reference
    ref = _reference_forward(tower, images)[:, 1:]
    assert bool(jnp.allclose(feats, ref, atol=5e-2, rtol=5e-2))

    print("KERNEL_OK")
</pallas_src>

<mosaic_0001>
module attributes {stable_mosaic.version = 11 : i64} {
  func.func @_vision_tower_kernel(%arg0: i32, %arg1: i32, %arg2: memref<16x192xbf16, #tpu.memory_space<vmem>>, %arg3: memref<192x128xbf16, #tpu.memory_space<vmem>>, %arg4: memref<8x128xf32, #tpu.memory_space<vmem>>, %arg5: memref<1x1x128xf32, #tpu.memory_space<vmem>>, %arg6: memref<1x1x128xf32, #tpu.memory_space<vmem>>, %arg7: memref<1x3x128x128xbf16, #tpu.memory_space<vmem>>, %arg8: memref<1x3x1x128xf32, #tpu.memory_space<vmem>>, %arg9: memref<1x128x128xbf16, #tpu.memory_space<vmem>>, %arg10: memref<1x1x128xf32, #tpu.memory_space<vmem>>, %arg11: memref<1x1x128xf32, #tpu.memory_space<vmem>>, %arg12: memref<1x1x128xf32, #tpu.memory_space<vmem>>, %arg13: memref<1x128x512xbf16, #tpu.memory_space<vmem>>, %arg14: memref<1x1x512xf32, #tpu.memory_space<vmem>>, %arg15: memref<1x512x128xbf16, #tpu.memory_space<vmem>>, %arg16: memref<1x1x128xf32, #tpu.memory_space<vmem>>, %arg17: memref<16x128xf32, #tpu.memory_space<vmem>>) attributes {dimension_semantics = [#tpu.dimension_semantics<parallel>, #tpu.dimension_semantics<arbitrary>], iteration_bounds = array<i64: 2, 2>, scalar_prefetch = 0 : i64, scratch_operands = 0 : i64, tpu.core_type = #tpu.core_type<tc>, window_params = [{transform_indices = @transform_0, window_bounds = array<i64: 16, 192>}, {pipeline_mode = #tpu.pipeline_mode<synchronous>, transform_indices = @transform_1, window_bounds = array<i64: 192, 128>}, {pipeline_mode = #tpu.pipeline_mode<synchronous>, transform_indices = @transform_2, window_bounds = array<i64: 8, 128>}, {transform_indices = @transform_3, window_bounds = array<i64: 1, 1, 128>}, {transform_indices = @transform_4, window_bounds = array<i64: 1, 1, 128>}, {transform_indices = @transform_5, window_bounds = array<i64: 1, 3, 128, 128>}, {transform_indices = @transform_6, window_bounds = array<i64: 1, 3, 1, 128>}, {transform_indices = @transform_7, window_bounds = array<i64: 1, 128, 128>}, {transform_indices = @transform_8, window_bounds = array<i64: 1, 1, 128>}, {transform_indices = @transform_9, window_bounds = array<i64: 1, 1, 128>}, {transform_indices = @transform_10, window_bounds = array<i64: 1, 1, 128>}, {transform_indices = @transform_11, window_bounds = array<i64: 1, 128, 512>}, {transform_indices = @transform_12, window_bounds = array<i64: 1, 1, 512>}, {transform_indices = @transform_13, window_bounds = array<i64: 1, 512, 128>}, {transform_indices = @transform_14, window_bounds = array<i64: 1, 1, 128>}, {transform_indices = @transform_15, window_bounds = array<i64: 16, 128>}]} {
    %c0_i32 = arith.constant 0 : i32
    %0 = arith.cmpi eq, %arg1, %c0_i32 : i32
    %1 = arith.extui %0 : i1 to i32
    %c0_i32_0 = arith.constant 0 : i32
    %2 = arith.cmpi ne, %1, %c0_i32_0 : i32
    scf.if %2 {
      %c0_80 = arith.constant 0 : index
      %c0_81 = arith.constant 0 : index
      %139 = vector.load %arg2[%c0_80, %c0_81] : memref<16x192xbf16, #tpu.memory_space<vmem>>, vector<16x192xbf16>
      %c0_82 = arith.constant 0 : index
      %c0_83 = arith.constant 0 : index
      %140 = vector.load %arg3[%c0_82, %c0_83] : memref<192x128xbf16, #tpu.memory_space<vmem>>, vector<192x128xbf16>
      %cst_84 = arith.constant dense<0.000000e+00> : vector<16x128xf32>
      %141 = tpu.matmul %139, %140, %cst_84 {dimension_numbers = #tpu.dot_dimension_numbers<[1], [0], [0], [1], [0, 0, 1, 1], [], []>} : vector<16x192xbf16>, vector<192x128xbf16>, vector<16x128xf32> -> vector<16x128xf32>
      %142 = vector.shape_cast %141 : vector<16x128xf32> to vector<2x8x128xf32>
      %c0_85 = arith.constant 0 : index
      %c0_86 = arith.constant 0 : index
      %143 = vector.load %arg4[%c0_85, %c0_86] : memref<8x128xf32, #tpu.memory_space<vmem>>, vector<8x128xf32>
      %144 = vector.shape_cast %143 : vector<8x128xf32> to vector<1x8x128xf32>
      %145 = vector.broadcast %144 : vector<1x8x128xf32> to vector<2x8x128xf32>
      %146 = arith.addf %142, %145 : vector<2x8x128xf32>
      %147 = vector.shape_cast %146 : vector<2x8x128xf32> to vector<16x128xf32>
      %c0_87 = arith.constant 0 : index
      %c0_88 = arith.constant 0 : index
      %148 = vector.load %arg17[%c0_87, %c0_88] : memref<16x128xf32, #tpu.memory_space<vmem>>, vector<16x128xf32>
      tpu.vector_store %arg17[%c0_87, %c0_88], %147 {strides = array<i32>} : memref<16x128xf32, #tpu.memory_space<vmem>>, vector<16x128xf32>,
    } else {
    }
    %c0 = arith.constant 0 : index
    %c0_1 = arith.constant 0 : index
    %3 = vector.load %arg17[%c0, %c0_1] : memref<16x128xf32, #tpu.memory_space<vmem>>, vector<16x128xf32>
    %c0_2 = arith.constant 0 : index
    %c0_3 = arith.constant 0 : index
    %c0_4 = arith.constant 0 : index
    %4 = vector.load %arg5[%c0_2, %c0_3, %c0_4] : memref<1x1x128xf32, #tpu.memory_space<vmem>>, vector<1x1x128xf32>
    %5 = vector.shape_cast %4 : vector<1x1x128xf32> to vector<1x128xf32>
    %c0_5 = arith.constant 0 : index
    %c0_6 = arith.constant 0 : index
    %c0_7 = arith.constant 0 : index
    %6 = vector.load %arg6[%c0_5, %c0_6, %c0_7] : memref<1x1x128xf32, #tpu.memory_space<vmem>>, vector<1x1x128xf32>
    %7 = vector.shape_cast %6 : vector<1x1x128xf32> to vector<1x128xf32>
    %cst = arith.constant dense<0.000000e+00> : vector<16xf32>
    %8 = vector.multi_reduction <add>, %3, %cst [1] : vector<16x128xf32> to vector<16xf32>
    %9 = vector.shape_cast %8 : vector<16xf32> to vector<16x1xf32>
    %cst_8 = arith.constant 1.280000e+02 : f32
    %10 = vector.broadcast %cst_8 : f32 to vector<16x1xf32>
    %11 = arith.divf %9, %10 : vector<16x1xf32>
    %12 = vector.broadcast %11 : vector<16x1xf32> to vector<16x128xf32>
    %13 = arith.subf %3, %12 : vector<16x128xf32>
    %14 = arith.mulf %13, %13 : vector<16x128xf32>
    %cst_9 = arith.constant dense<0.000000e+00> : vector<16xf32>
    %15 = vector.multi_reduction <add>, %14, %cst_9 [1] : vector<16x128xf32> to vector<16xf32>
    %16 = vector.shape_cast %15 : vector<16xf32> to vector<16x1xf32>
    %cst_10 = arith.constant 1.280000e+02 : f32
    %17 = vector.broadcast %cst_10 : f32 to vector<16x1xf32>
    %18 = arith.divf %16, %17 : vector<16x1xf32>
    %cst_11 = arith.constant 9.99999974E-6 : f32
    %19 = vector.broadcast %cst_11 : f32 to vector<16x1xf32>
    %20 = arith.addf %18, %19 : vector<16x1xf32>
    %21 = math.rsqrt %20 : vector<16x1xf32>
    %22 = vector.broadcast %21 : vector<16x1xf32> to vector<16x128xf32>
    %23 = arith.mulf %13, %22 : vector<16x128xf32>
    %24 = vector.broadcast %5 : vector<1x128xf32> to vector<16x128xf32>
    %25 = arith.mulf %23, %24 : vector<16x128xf32>
    %26 = vector.broadcast %7 : vector<1x128xf32> to vector<16x128xf32>
    %27 = arith.addf %25, %26 : vector<16x128xf32>
    %28 = arith.truncf %27 : vector<16x128xf32> to vector<16x128xbf16>
    %c0_12 = arith.constant 0 : index
    %c0_13 = arith.constant 0 : index
    %c0_14 = arith.constant 0 : index
    %c0_15 = arith.constant 0 : index
    %29 = vector.load %arg7[%c0_12, %c0_13, %c0_14, %c0_15] : memref<1x3x128x128xbf16, #tpu.memory_space<vmem>>, vector<1x1x128x128xbf16>
    %30 = vector.shape_cast %29 : vector<1x1x128x128xbf16> to vector<128x128xbf16>
    %cst_16 = arith.constant dense<0.000000e+00> : vector<16x128xf32>
    %31 = tpu.matmul %28, %30, %cst_16 {dimension_numbers = #tpu.dot_dimension_numbers<[1], [0], [0], [1], [0, 0, 1, 1], [], []>} : vector<16x128xbf16>, vector<128x128xbf16>, vector<16x128xf32> -> vector<16x128xf32>
    %c0_17 = arith.constant 0 : index
    %c0_18 = arith.constant 0 : index
    %c0_19 = arith.constant 0 : index
    %c0_20 = arith.constant 0 : index
    %32 = vector.load %arg8[%c0_17, %c0_18, %c0_19, %c0_20] : memref<1x3x1x128xf32, #tpu.memory_space<vmem>>, vector<1x1x1x128xf32>
    %33 = vector.shape_cast %32 : vector<1x1x1x128xf32> to vector<1x128xf32>
    %34 = vector.broadcast %33 : vector<1x128xf32> to vector<16x128xf32>
    %35 = arith.addf %31, %34 : vector<16x128xf32>
    %c0_21 = arith.constant 0 : index
    %c1 = arith.constant 1 : index
    %c0_22 = arith.constant 0 : index
    %c0_23 = arith.constant 0 : index
    %36 = vector.load %arg7[%c0_21, %c1, %c0_22, %c0_23] : memref<1x3x128x128xbf16, #tpu.memory_space<vmem>>, vector<1x1x128x128xbf16>
    %37 = vector.shape_cast %36 : vector<1x1x128x128xbf16> to vector<128x128xbf16>
    %cst_24 = arith.constant dense<0.000000e+00> : vector<16x128xf32>
    %38 = tpu.matmul %28, %37, %cst_24 {dimension_numbers = #tpu.dot_dimension_numbers<[1], [0], [0], [1], [0, 0, 1, 1], [], []>} : vector<16x128xbf16>, vector<128x128xbf16>, vector<16x128xf32> -> vector<16x128xf32>
    %c0_25 = arith.constant 0 : index
    %c1_26 = arith.constant 1 : index
    %c0_27 = arith.constant 0 : index
    %c0_28 = arith.constant 0 : index
    %39 = vector.load %arg8[%c0_25, %c1_26, %c0_27, %c0_28] : memref<1x3x1x128xf32, #tpu.memory_space<vmem>>, vector<1x1x1x128xf32>
    %40 = vector.shape_cast %39 : vector<1x1x1x128xf32> to vector<1x128xf32>
    %41 = vector.broadcast %40 : vector<1x128xf32> to vector<16x128xf32>
    %42 = arith.addf %38, %41 : vector<16x128xf32>
    %c0_29 = arith.constant 0 : index
    %c2 = arith.constant 2 : index
    %c0_30 = arith.constant 0 : index
    %c0_31 = arith.constant 0 : index
    %43 = vector.load %arg7[%c0_29, %c2, %c0_30, %c0_31] : memref<1x3x128x128xbf16, #tpu.memory_space<vmem>>, vector<1x1x128x128xbf16>
    %44 = vector.shape_cast %43 : vector<1x1x128x128xbf16> to vector<128x128xbf16>
    %cst_32 = arith.constant dense<0.000000e+00> : vector<16x128xf32>
    %45 = tpu.matmul %28, %44, %cst_32 {dimension_numbers = #tpu.dot_dimension_numbers<[1], [0], [0], [1], [0, 0, 1, 1], [], []>} : vector<16x128xbf16>, vector<128x128xbf16>, vector<16x128xf32> -> vector<16x128xf32>
    %c0_33 = arith.constant 0 : index
    %c2_34 = arith.constant 2 : index
    %c0_35 = arith.constant 0 : index
    %c0_36 = arith.constant 0 : index
    %46 = vector.load %arg8[%c0_33, %c2_34, %c0_35, %c0_36] : memref<1x3x1x128xf32, #tpu.memory_space<vmem>>, vector<1x1x1x128xf32>
    %47 = vector.shape_cast %46 : vector<1x1x1x128xf32> to vector<1x128xf32>
    %48 = vector.broadcast %47 : vector<1x128xf32> to vector<16x128xf32>
    %49 = arith.addf %45, %48 : vector<16x128xf32>
    %50 = vector.shape_cast %35 : vector<16x128xf32> to vector<2x8x128xf32>
    %51 = arith.truncf %50 : vector<2x8x128xf32> to vector<2x8x128xbf16>
    %52 = vector.shape_cast %42 : vector<16x128xf32> to vector<2x8x128xf32>
    %53 = arith.truncf %52 : vector<2x8x128xf32> to vector<2x8x128xbf16>
    %54 = vector.shape_cast %49 : vector<16x128xf32> to vector<2x8x128xf32>
    %55 = arith.truncf %54 : vector<2x8x128xf32> to vector<2x8x128xbf16>
    "tpu.trace_start"() <{level = 10 : i32, message = "bqd,bkd->bqk"}> : () -> ()
    %cst_37 = arith.constant dense<0.000000e+00> : vector<2x8x8xf32>
    %56 = tpu.matmul %51, %53, %cst_37 {dimension_numbers = #tpu.dot_dimension_numbers<[2], [2], [1], [1], [0, 0, 0, 1, 1, 1], [0], [0]>} : vector<2x8x128xbf16>, vector<2x8x128xbf16>, vector<2x8x8xf32> -> vector<2x8x8xf32>
    "tpu.trace_stop"() : () -> ()
    %57 = tpu.iota {dimensions = array<i32: 2>} : vector<2x8x8xi32>
    %c5_i32 = arith.constant 5 : i32
    %58 = vector.broadcast %c5_i32 : i32 to vector<2x8x8xi32>
    %59 = arith.cmpi slt, %57, %58 : vector<2x8x8xi32>
    %cst_38 = arith.constant -1.000000e+30 : f32
    %60 = vector.broadcast %cst_38 : f32 to vector<2x8x8xf32>
    %61 = arith.select %59, %56, %60 : vector<2x8x8xi1>, vector<2x8x8xf32>
    %cst_39 = arith.constant dense<0xFF800000> : vector<2x8xf32>
    %62 = vector.multi_reduction <maximumf>, %61, %cst_39 [2] : vector<2x8x8xf32> to vector<2x8xf32>
    %63 = vector.shape_cast %62 : vector<2x8xf32> to vector<2x8x1xf32>
    %64 = vector.broadcast %63 : vector<2x8x1xf32> to vector<2x8x8xf32>
    %65 = arith.subf %61, %64 : vector<2x8x8xf32>
    %66 = math.exp %65 : vector<2x8x8xf32>
    %cst_40 = arith.constant dense<0.000000e+00> : vector<2x8xf32>
    %67 = vector.multi_reduction <add>, %66, %cst_40 [2] : vector<2x8x8xf32> to vector<2x8xf32>
    %68 = vector.shape_cast %67 : vector<2x8xf32> to vector<2x8x1xf32>
    %69 = tpu.reciprocal %68 {approx = true} : vector<2x8x1xf32> -> vector<2x8x1xf32>
    %70 = vector.broadcast %69 : vector<2x8x1xf32> to vector<2x8x8xf32>
    %71 = arith.mulf %66, %70 : vector<2x8x8xf32>
    %72 = arith.truncf %71 : vector<2x8x8xf32> to vector<2x8x8xbf16>
    "tpu.trace_start"() <{level = 10 : i32, message = "bqk,bkd->bqd"}> : () -> ()
    %cst_41 = arith.constant dense<0.000000e+00> : vector<2x8x128xf32>
    %73 = tpu.matmul %72, %55, %cst_41 {dimension_numbers = #tpu.dot_dimension_numbers<[2], [1], [1], [2], [0, 0, 0, 1, 1, 2], [0], [0]>} : vector<2x8x8xbf16>, vector<2x8x128xbf16>, vector<2x8x128xf32> -> vector<2x8x128xf32>
    "tpu.trace_stop"() : () -> ()
    %74 = vector.shape_cast %73 : vector<2x8x128xf32> to vector<16x128xf32>
    %75 = arith.truncf %74 : vector<16x128xf32> to vector<16x128xbf16>
    %c0_42 = arith.constant 0 : index
    %c0_43 = arith.constant 0 : index
    %c0_44 = arith.constant 0 : index
    %76 = vector.load %arg9[%c0_42, %c0_43, %c0_44] : memref<1x128x128xbf16, #tpu.memory_space<vmem>>, vector<1x128x128xbf16>
    %77 = vector.shape_cast %76 : vector<1x128x128xbf16> to vector<128x128xbf16>
    %cst_45 = arith.constant dense<0.000000e+00> : vector<16x128xf32>
    %78 = tpu.matmul %75, %77, %cst_45 {dimension_numbers = #tpu.dot_dimension_numbers<[1], [0], [0], [1], [0, 0, 1, 1], [], []>} : vector<16x128xbf16>, vector<128x128xbf16>, vector<16x128xf32> -> vector<16x128xf32>
    %c0_46 = arith.constant 0 : index
    %c0_47 = arith.constant 0 : index
    %c0_48 = arith.constant 0 : index
    %79 = vector.load %arg10[%c0_46, %c0_47, %c0_48] : memref<1x1x128xf32, #tpu.memory_space<vmem>>, vector<1x1x128xf32>
    %80 = vector.shape_cast %79 : vector<1x1x128xf32> to vector<1x128xf32>
    %81 = vector.broadcast %80 : vector<1x128xf32> to vector<16x128xf32>
    %82 = arith.addf %78, %81 : vector<16x128xf32>
    %83 = arith.addf %3, %82 : vector<16x128xf32>
    %c0_49 = arith.constant 0 : index
    %c0_50 = arith.constant 0 : index
    %c0_51 = arith.constant 0 : index
    %84 = vector.load %arg11[%c0_49, %c0_50, %c0_51] : memref<1x1x128xf32, #tpu.memory_space<vmem>>, vector<1x1x128xf32>
    %85 = vector.shape_cast %84 : vector<1x1x128xf32> to vector<1x128xf32>
    %c0_52 = arith.constant 0 : index
    %c0_53 = arith.constant 0 : index
    %c0_54 = arith.constant 0 : index
    %86 = vector.load %arg12[%c0_52, %c0_53, %c0_54] : memref<1x1x128xf32, #tpu.memory_space<vmem>>, vector<1x1x128xf32>
    %87 = vector.shape_cast %86 : vector<1x1x128xf32> to vector<1x128xf32>
    %cst_55 = arith.constant dense<0.000000e+00> : vector<16xf32>
    %88 = vector.multi_reduction <add>, %83, %cst_55 [1] : vector<16x128xf32> to vector<16xf32>
    %89 = vector.shape_cast %88 : vector<16xf32> to vector<16x1xf32>
    %cst_56 = arith.constant 1.280000e+02 : f32
    %90 = vector.broadcast %cst_56 : f32 to vector<16x1xf32>
    %91 = arith.divf %89, %90 : vector<16x1xf32>
    %92 = vector.broadcast %91 : vector<16x1xf32> to vector<16x128xf32>
    %93 = arith.subf %83, %92 : vector<16x128xf32>
    %94 = arith.mulf %93, %93 : vector<16x128xf32>
    %cst_57 = arith.constant dense<0.000000e+00> : vector<16xf32>
    %95 = vector.multi_reduction <add>, %94, %cst_57 [1] : vector<16x128xf32> to vector<16xf32>
    %96 = vector.shape_cast %95 : vector<16xf32> to vector<16x1xf32>
    %cst_58 = arith.constant 1.280000e+02 : f32
    %97 = vector.broadcast %cst_58 : f32 to vector<16x1xf32>
    %98 = arith.divf %96, %97 : vector<16x1xf32>
    %cst_59 = arith.constant 9.99999974E-6 : f32
    %99 = vector.broadcast %cst_59 : f32 to vector<16x1xf32>
    %100 = arith.addf %98, %99 : vector<16x1xf32>
    %101 = math.rsqrt %100 : vector<16x1xf32>
    %102 = vector.broadcast %101 : vector<16x1xf32> to vector<16x128xf32>
    %103 = arith.mulf %93, %102 : vector<16x128xf32>
    %104 = vector.broadcast %85 : vector<1x128xf32> to vector<16x128xf32>
    %105 = arith.mulf %103, %104 : vector<16x128xf32>
    %106 = vector.broadcast %87 : vector<1x128xf32> to vector<16x128xf32>
    %107 = arith.addf %105, %106 : vector<16x128xf32>
    %108 = arith.truncf %107 : vector<16x128xf32> to vector<16x128xbf16>
    %c0_60 = arith.constant 0 : index
    %c0_61 = arith.constant 0 : index
    %c0_62 = arith.constant 0 : index
    %109 = vector.load %arg13[%c0_60, %c0_61, %c0_62] : memref<1x128x512xbf16, #tpu.memory_space<vmem>>, vector<1x128x512xbf16>
    %110 = vector.shape_cast %109 : vector<1x128x512xbf16> to vector<128x512xbf16>
    %cst_63 = arith.constant dense<0.000000e+00> : vector<16x512xf32>
    %111 = tpu.matmul %108, %110, %cst_63 {dimension_numbers = #tpu.dot_dimension_numbers<[1], [0], [0], [1], [0, 0, 1, 1], [], []>} : vector<16x128xbf16>, vector<128x512xbf16>, vector<16x512xf32> -> vector<16x512xf32>
    %c0_64 = arith.constant 0 : index
    %c0_65 = arith.constant 0 : index
    %c0_66 = arith.constant 0 : index
    %112 = vector.load %arg14[%c0_64, %c0_65, %c0_66] : memref<1x1x512xf32, #tpu.memory_space<vmem>>, vector<1x1x512xf32>
    %113 = vector.shape_cast %112 : vector<1x1x512xf32> to vector<1x512xf32>
    %114 = vector.broadcast %113 : vector<1x512xf32> to vector<16x512xf32>
    %115 = arith.addf %111, %114 : vector<16x512xf32>
    %116 = arith.mulf %115, %115 : vector<16x512xf32>
    %117 = arith.mulf %115, %116 : vector<16x512xf32>
    %cst_67 = arith.constant 4.471500e-02 : f32
    %118 = vector.broadcast %cst_67 : f32 to vector<16x512xf32>
    %119 = arith.mulf %118, %117 : vector<16x512xf32>
    %120 = arith.addf %115, %119 : vector<16x512xf32>
    %cst_68 = arith.constant 0.797884583 : f32
    %121 = vector.broadcast %cst_68 : f32 to vector<16x512xf32>
    %122 = arith.mulf %121, %120 : vector<16x512xf32>
    %123 = math.tanh %122 : vector<16x512xf32>
    %cst_69 = arith.constant 1.000000e+00 : f32
    %124 = vector.broadcast %cst_69 : f32 to vector<16x512xf32>
    %125 = arith.addf %124, %123 : vector<16x512xf32>
    %cst_70 = arith.constant 5.000000e-01 : f32
    %126 = vector.broadcast %cst_70 : f32 to vector<16x512xf32>
    %127 = arith.mulf %126, %125 : vector<16x512xf32>
    %128 = arith.mulf %115, %127 : vector<16x512xf32>
    %129 = arith.truncf %128 : vector<16x512xf32> to vector<16x512xbf16>
    %c0_71 = arith.constant 0 : index
    %c0_72 = arith.constant 0 : index
    %c0_73 = arith.constant 0 : index
    %130 = vector.load %arg15[%c0_71, %c0_72, %c0_73] : memref<1x512x128xbf16, #tpu.memory_space<vmem>>, vector<1x512x128xbf16>
    %131 = vector.shape_cast %130 : vector<1x512x128xbf16> to vector<512x128xbf16>
    %cst_74 = arith.constant dense<0.000000e+00> : vector<16x128xf32>
    %132 = tpu.matmul %129, %131, %cst_74 {dimension_numbers = #tpu.dot_dimension_numbers<[1], [0], [0], [1], [0, 0, 1, 1], [], []>} : vector<16x512xbf16>, vector<512x128xbf16>, vector<16x128xf32> -> vector<16x128xf32>
    %c0_75 = arith.constant 0 : index
    %c0_76 = arith.constant 0 : index
    %c0_77 = arith.constant 0 : index
    %133 = vector.load %arg16[%c0_75, %c0_76, %c0_77] : memref<1x1x128xf32, #tpu.memory_space<vmem>>, vector<1x1x128xf32>
    %134 = vector.shape_cast %133 : vector<1x1x128xf32> to vector<1x128xf32>
    %135 = vector.broadcast %134 : vector<1x128xf32> to vector<16x128xf32>
    %136 = arith.addf %132, %135 : vector<16x128xf32>
    %137 = arith.addf %83, %136 : vector<16x128xf32>
    %c0_78 = arith.constant 0 : index
    %c0_79 = arith.constant 0 : index
    %138 = vector.load %arg17[%c0_78, %c0_79] : memref<16x128xf32, #tpu.memory_space<vmem>>, vector<16x128xf32>
    tpu.vector_store %arg17[%c0_78, %c0_79], %137 {strides = array<i32>} : memref<16x128xf32, #tpu.memory_space<vmem>>, vector<16x128xf32>,
    return
  }
  func.func @transform_0(%arg0: i32, %arg1: i32) -> (i32, i32) {
    %c0_i32 = arith.constant 0 : i32
    %c0_i32_0 = arith.constant 0 : i32
    return %arg0, %c0_i32 : i32, i32
  }
  func.func @transform_1(%arg0: i32, %arg1: i32) -> (i32, i32) {
    %c0_i32 = arith.constant 0 : i32
    %c0_i32_0 = arith.constant 0 : i32
    %c0_i32_1 = arith.constant 0 : i32
    return %c0_i32, %c0_i32_0 : i32, i32
  }
  func.func @transform_2(%arg0: i32, %arg1: i32) -> (i32, i32) {
    %c0_i32 = arith.constant 0 : i32
    %c0_i32_0 = arith.constant 0 : i32
    %c0_i32_1 = arith.constant 0 : i32
    return %c0_i32, %c0_i32_0 : i32, i32
  }
  func.func @transform_3(%arg0: i32, %arg1: i32) -> (i32, i32, i32) {
    %c0_i32 = arith.constant 0 : i32
    %c0_i32_0 = arith.constant 0 : i32
    %c0_i32_1 = arith.constant 0 : i32
    return %arg1, %c0_i32, %c0_i32_0 : i32, i32, i32
  }
  func.func @transform_4(%arg0: i32, %arg1: i32) -> (i32, i32, i32) {
    %c0_i32 = arith.constant 0 : i32
    %c0_i32_0 = arith.constant 0 : i32
    %c0_i32_1 = arith.constant 0 : i32
    return %arg1, %c0_i32, %c0_i32_0 : i32, i32, i32
  }
  func.func @transform_5(%arg0: i32, %arg1: i32) -> (i32, i32, i32, i32) {
    %c0_i32 = arith.constant 0 : i32
    %c0_i32_0 = arith.constant 0 : i32
    %c0_i32_1 = arith.constant 0 : i32
    %c0_i32_2 = arith.constant 0 : i32
    return %arg1, %c0_i32, %c0_i32_0, %c0_i32_1 : i32, i32, i32, i32
  }
  func.func @transform_6(%arg0: i32, %arg1: i32) -> (i32, i32, i32, i32) {
    %c0_i32 = arith.constant 0 : i32
    %c0_i32_0 = arith.constant 0 : i32
    %c0_i32_1 = arith.constant 0 : i32
    %c0_i32_2 = arith.constant 0 : i32
    return %arg1, %c0_i32, %c0_i32_0, %c0_i32_1 : i32, i32, i32, i32
  }
  func.func @transform_7(%arg0: i32, %arg1: i32) -> (i32, i32, i32) {
    %c0_i32 = arith.constant 0 : i32
    %c0_i32_0 = arith.constant 0 : i32
    %c0_i32_1 = arith.constant 0 : i32
    return %arg1, %c0_i32, %c0_i32_0 : i32, i32, i32
  }
  func.func @transform_8(%arg0: i32, %arg1: i32) -> (i32, i32, i32) {
    %c0_i32 = arith.constant 0 : i32
    %c0_i32_0 = arith.constant 0 : i32
    %c0_i32_1 = arith.constant 0 : i32
    return %arg1, %c0_i32, %c0_i32_0 : i32, i32, i32
  }
  func.func @transform_9(%arg0: i32, %arg1: i32) -> (i32, i32, i32) {
    %c0_i32 = arith.constant 0 : i32
    %c0_i32_0 = arith.constant 0 : i32
    %c0_i32_1 = arith.constant 0 : i32
    return %arg1, %c0_i32, %c0_i32_0 : i32, i32, i32
  }
  func.func @transform_10(%arg0: i32, %arg1: i32) -> (i32, i32, i32) {
    %c0_i32 = arith.constant 0 : i32
    %c0_i32_0 = arith.constant 0 : i32
    %c0_i32_1 = arith.constant 0 : i32
    return %arg1, %c0_i32, %c0_i32_0 : i32, i32, i32
  }
  func.func @transform_11(%arg0: i32, %arg1: i32) -> (i32, i32, i32) {
    %c0_i32 = arith.constant 0 : i32
    %c0_i32_0 = arith.constant 0 : i32
    %c0_i32_1 = arith.constant 0 : i32
    return %arg1, %c0_i32, %c0_i32_0 : i32, i32, i32
  }
  func.func @transform_12(%arg0: i32, %arg1: i32) -> (i32, i32, i32) {
    %c0_i32 = arith.constant 0 : i32
    %c0_i32_0 = arith.constant 0 : i32
    %c0_i32_1 = arith.constant 0 : i32
    return %arg1, %c0_i32, %c0_i32_0 : i32, i32, i32
  }
  func.func @transform_13(%arg0: i32, %arg1: i32) -> (i32, i32, i32) {
    %c0_i32 = arith.constant 0 : i32
    %c0_i32_0 = arith.constant 0 : i32
    %c0_i32_1 = arith.constant 0 : i32
    return %arg1, %c0_i32, %c0_i32_0 : i32, i32, i32
  }
  func.func @transform_14(%arg0: i32, %arg1: i32) -> (i32, i32, i32) {
    %c0_i32 = arith.constant 0 : i32
    %c0_i32_0 = arith.constant 0 : i32
    %c0_i32_1 = arith.constant 0 : i32
    return %arg1, %c0_i32, %c0_i32_0 : i32, i32, i32
  }
  func.func @transform_15(%arg0: i32, %arg1: i32) -> (i32, i32) {
    %c0_i32 = arith.constant 0 : i32
    %c0_i32_0 = arith.constant 0 : i32
    return %arg0, %c0_i32 : i32, i32
  }
}

</mosaic_0001>

<bundles_post_ra>
// kernel: tpu_custom_call.1
= control target key start
LH: loop header
LB: loop body
LE: loop exit
PB: predicated region body
PF: predicated region fallthrough
CT: control target
= control target key end

     0   :  { %s4752_s0 = inlined_call_operand.hbm [shape: bf16[32,192], index: 0, kind: input, shape index: {}]   ;;  %s4753_s1 = inlined_call_operand.hbm [shape: bf16[192,128], index: 1, kind: input, shape index: {}]   ;;  %s4754_s2 = inlined_call_operand.hbm [shape: f32[8,128], index: 2, kind: input, shape index: {}]   ;;  %s4755_s3 = inlined_call_operand.vmem [shape: f32[2,1,128], index: 3, kind: input, shape index: {}]   ;;  %s4756_s4 = inlined_call_operand.hbm [shape: f32[2,1,128], index: 4, kind: input, shape index: {}]   ;;  %s4757_s5 = inlined_call_operand.hbm [shape: bf16[2,3,128,128], index: 5, kind: input, shape index: {}]   ;;  %s4758_s6 = inlined_call_operand.hbm [shape: f32[2,3,1,128], index: 6, kind: input, shape index: {}]   ;;  %s4759_s7 = inlined_call_operand.hbm [shape: bf16[2,128,128], index: 7, kind: input, shape index: {}]   ;;  %s4760_s8 = inlined_call_operand.hbm [shape: f32[2,1,128], index: 8, kind: input, shape index: {}]   ;;  %s4761_s9 = inlined_call_operand.hbm [shape: f32[2,1,128], index: 9, kind: input, shape index: {}]   ;;  %s4762_s10 = inlined_call_operand.hbm [shape: f32[2,1,128], index: 10, kind: input, shape index: {}]   ;;  %s4763_s11 = inlined_call_operand.hbm [shape: bf16[2,128,512], index: 11, kind: input, shape index: {}]   ;;  %s4764_s12 = inlined_call_operand.vmem [shape: f32[2,1,512], index: 12, kind: input, shape index: {}]   ;;  %s4765_s13 = inlined_call_operand.hbm [shape: bf16[2,512,128], index: 13, kind: input, shape index: {}]   ;;  %s4766_s14 = inlined_call_operand.vmem [shape: f32[2,1,128], index: 14, kind: input, shape index: {}]   ;;  %s4767_s15 = inlined_call_operand.hbm [shape: f32[32,128], index: 15, kind: output, shape index: {}]  }
   0x1   :  { %4790 = sst [smem:[#allocation44_spill]] %s4752_s0 }
   0x2   :  { %4791 = sst [smem:[#allocation45_spill]] %s4753_s1 }
   0x3   :  { %4792 = sst [smem:[#allocation46_spill]] %s4754_s2 }
   0x4   :  { %4793 = sst [smem:[#allocation47_spill]] %s4755_s3 }
   0x5   :  { %4794 = sst [smem:[#allocation48_spill]] %s4756_s4 }
   0x6   :  { %4795 = sst [smem:[#allocation49_spill]] %s4757_s5 }
   0x7   :  { %4796 = sst [smem:[#allocation50_spill]] %s4758_s6 }
   0x8   :  { %4797 = sst [smem:[#allocation51_spill]] %s4759_s7 }
   0x9   :  { %4798 = sst [smem:[#allocation52_spill]] %s4760_s8 }
   0xa   :  { %4799 = sst [smem:[#allocation53_spill]] %s4761_s9 }
   0xb   :  { %4800 = sst [smem:[#allocation54_spill]] %s4762_s10 }
   0xc   :  { %4801 = sst [smem:[#allocation55_spill]] %s4763_s11 }
   0xd   :  { %4802 = sst [smem:[#allocation56_spill]] %s4764_s12 }
   0xe   :  { %4803 = sst [smem:[#allocation57_spill]] %s4765_s13 }
   0xf   :  { %4804 = sst [smem:[#allocation58_spill]] %s4766_s14 }
  0x10   :  { %4805 = sst [smem:[#allocation59_spill]] %s4767_s15 }
  0x11   :  { %20 = vsyncpa [#allocation3], 0 }
  0x12   :  { %22 = vsyncpa [#allocation3 + $0x1], 0 }
  0x13   :  { %23 = vsyncpa [#allocation6], 0 }
  0x14   :  { %24 = vsyncpa [#allocation9], 0 }
  0x15   :  { %26 = vsyncpa [#allocation9 + $0x1], 0 }
  0x16   :  { %27 = vsyncpa [#allocation12], 0 }
  0x17   :  { %29 = vsyncpa [#allocation12 + $0x1], 0 }
  0x18   :  { %30 = vsyncpa [#allocation15], 0 }
  0x19   :  { %32 = vsyncpa [#allocation15 + $0x1], 0 }
  0x1a   :  { %33 = vsyncpa [#allocation18], 0 }
  0x1b   :  { %35 = vsyncpa [#allocation18 + $0x1], 0 }
  0x1c   :  { %36 = vsyncpa [#allocation21], 0 }
  0x1d   :  { %38 = vsyncpa [#allocation21 + $0x1], 0 }
  0x1e   :  { %39 = vsyncpa [#allocation4], 0 }
  0x1f   :  { %41 = vsyncpa [#allocation4 + $0x1], 0  ;;  %s4080_s18 = smov 0   ;;  %s4082_s19 = smov 0  }
  0x20   :  { %s4084_s20 = smov 0   ;;  %s4086_s21 = smov 0  }
  0x21   :  { %s4088_s22 = smov 0   ;;  %s4090_s23 = smov 0  }
  0x22   :  { %s4092_s24 = smov 0   ;;  %s4094_s25 = smov 0  }
  0x23   :  { %s4096_s26 = smov 0   ;;  %s4098_s27 = smov 0  }
  0x24   :  { %s4100_s28 = smov 0  }
  0x25 LB: > { %4806 = sst [smem:[#allocation31_spill]] %s3950_s19  ;;  %s4134_s29 = sadd.s32 4294967295, %s3986_s28   ;;  %s3986_s28 = sphi %s4100_s28, %s47_s28   ;;  %s3982_s27 = sphi %s4098_s27, %s4871_s27   ;;  %s3978_s26 = sphi %s4096_s26, %s4870_s26   ;;  %s3974_s25 = sphi %s4094_s25, %s4869_s25   ;;  %s3970_s24 = sphi %s4092_s24, %s4868_s24   ;;  %s3966_s23 = sphi %s4090_s23, %s4867_s23   ;;  %s3962_s22 = sphi %s4088_s22, %s4873_s22   ;;  %s3958_s21 = sphi %s4086_s21, %s4872_s21   ;;  %s3954_s20 = sphi %s4084_s20, %s4865_s20   ;;  %s3950_s19 = sphi %s4082_s19, %s4864_s19   ;;  %s3946_s18 = sphi %s4080_s18, %s4863_s18  }
  0x26   : > { %4807 = sst [smem:[#allocation32_spill]] %s3954_s20  ;;  %p74_p0 = scmp.eq.s32.totalorder %s3986_s28, 0 }
  0x27   : > { %4808 = sst [smem:[#allocation33_spill]] %s3966_s23  ;;  %p4779_p1 = scmp.eq.s32.totalorder %s4134_s29, 0 }
  0x28   : > { %4809 = sst [smem:[#allocation34_spill]] %s3970_s24  ;;  %p167_p2 = scmp.ne.s32.totalorder %s3954_s20, %s3950_s19 }
  0x29   : > { %4810 = sst [smem:[#allocation35_spill]] %s3974_s25  ;;  %p173_p3 = scmp.ne.s32.totalorder %s3950_s19, %s3946_s18 }
  0x2a   : > { %4811 = sst [smem:[#allocation36_spill]] %s3978_s26  ;;  %p457_p4 = scmp.eq.s32.totalorder %s4134_s29, 3 }
  0x2b   : > { %4812 = sst [smem:[#allocation37_spill]] %s3982_s27  ;;  %p4144_p5 = por %p167_p2, %p74_p0 }
  0x2c   : > { %p2627_p6 = scmp.ge.s32.totalorder %s3986_s28, 1  ;;  %p4151_p7 = por %p173_p3, %p4779_p1 }
  0x2d   : > { %p470_p8 = scmp.lt.s32.totalorder %s3986_s28, 5  ;;  %s4816_s1 = sld [smem:[#allocation45_spill]] }
  0x2e   : > { %s4814_s16 = scalar_select %p4151_p7, 1, 0 }
  0x2f   : > { %p4159_p9 = pnand %p2627_p6, %p470_p8  ;;  %s3988_s14 = smov [#allocation5]  }
  0x30   : > { %4815 = sst [smem:[#allocation38_spill]] %s4814_s16  ;;  %s483_s12 = sshll.u32 %s3988_s14, 4  ;;  %s484_s12 = int_to_ptr.vmem [resolvable:$true] %s483_s12 }
  0x31   : > { %s4817_s25 = scalar_select %p4159_p9, 1, 0 }
  0x32   : > { %p3289_p10 = pneg %p4159_p9  ;;  %p3333_p12 = scmp.lt.s32.totalorder %s3986_s28, 4 }
  0x33   : > { %s481_s18 = sshll.u32 %s4816_s1, 4  ;;  %4818 = sst [smem:[#allocation39_spill]] %s4817_s25  ;;  %s482_s18 = int_to_ptr.hbm [resolvable:$true] %s481_s18 }
  0x34   : > { %p4167_p11 = pnand %p3289_p10, %p4779_p1  ;;  %s4774_s15 = smov 64  }
  0x35   : > { %s4776_s17 = smov 4   ;;  %p4181_p13 = pnand %p3333_p12, %p4144_p5 }
  0x36   : > { %3292 = dma.hbm_to_vmem [thread:$0]  (!%p4167_p11), %s482_s18, 1536, %s484_s12, [#allocation6], %s4774_s15, %s4774_s15, %s4776_s17  }
  0x37   : > { %s4186_s1 = sand.u32 1, %s3986_s28   ;;  %s4189_s24 = sand.u32 1, %s3954_s20  }
  0x38   : > { %s4821_s4 = sld [smem:[#allocation48_spill]]  ;;  %s541_s12 = scalar_lea.vmem [#allocation8], %s4189_s24 }
  0x39   : > { %s548_s30 = sshll.u32 %s541_s12, 4  ;;  %s4778_s15 = scalar_lea.sflag [#allocation9], %s4186_s1  ;;  %s549_s30 = int_to_ptr.vmem [resolvable:$true] %s548_s30 }
  0x3a   : > { %s3255_s17 = smul.u32 3, %s4189_s24  ;;  %s4822_s6 = sld [smem:[#allocation50_spill]] }
  0x3b   : > { %s3256_s13 = smul.u32 3, %s3978_s26  ;;  %s4783_s9 = scalar_lea.sflag [#allocation12], %s4186_s1 }
  0x3c   : > { %s581_s11 = scalar_lea.vmem [#allocation11], %s3255_s17  ;;  %s4781_s7 = smov 16  }
  0x3d   : > { %s3992_s5 = smov 1   ;;  %s4823_s8 = sld [smem:[#allocation52_spill]] }
  0x3e   : > { %s544_s25 = scalar_lea.hbm %s4821_s4, %s3978_s26  ;;  %s623_s17 = scalar_lea.vmem [#allocation14], %s4189_s24 }
  0x3f   : > { %s546_s18 = sshll.u32 %s544_s25, 4  ;;  %s588_s25 = sshll.u32 %s581_s11, 4  ;;  %s547_s18 = int_to_ptr.hbm [resolvable:$true] %s546_s18  ;;  %s589_s25 = int_to_ptr.vmem [resolvable:$true] %s588_s25 }
  0x40   : > { %3302 = dma.hbm_to_vmem [thread:$0]  (!%p4181_p13), %s547_s18, 16, %s549_s30, %s4778_s15  }
  0x41   : > { %s585_s4 = scalar_lea.hbm %s4822_s6, %s3256_s13  ;;  %s4782_s19 = scalar_lea.sflag [#allocation15], %s4186_s1 }
  0x42   : > { %s586_s12 = sshll.u32 %s585_s4, 4  ;;  %s630_s4 = sshll.u32 %s623_s17, 4  ;;  %s587_s12 = int_to_ptr.hbm [resolvable:$true] %s586_s12  ;;  %s631_s4 = int_to_ptr.vmem [resolvable:$true] %s630_s4 }
  0x43   : > { %3308 = dma.hbm_to_vmem [thread:$0]  (!%p4181_p13), %s587_s12, 48, %s589_s25, %s4783_s9, %s4781_s7, %s4781_s7, %s3992_s5  }
  0x44   : > { %s626_s11 = scalar_lea.hbm %s4823_s8, %s3978_s26  ;;  %s4824_s10 = sld [smem:[#allocation54_spill]] }
  0x45   : > { %s628_s18 = sshll.u32 %s626_s11, 4  ;;  %s657_s12 = scalar_lea.vmem [#allocation17], %s4189_s24  ;;  %s629_s18 = int_to_ptr.hbm [resolvable:$true] %s628_s18 }
  0x46   : > { %3314 = dma.hbm_to_vmem [thread:$0]  (!%p4181_p13), %s629_s18, 16, %s631_s4, %s4782_s19  }
  0x47   : > { %s664_s13 = sshll.u32 %s657_s12, 4  ;;  %s4780_s30 = scalar_lea.sflag [#allocation18], %s4186_s1  ;;  %s665_s13 = int_to_ptr.vmem [resolvable:$true] %s664_s13 }
  0x48   : > { %s4825_s2 = sld [smem:[#allocation46_spill]]  ;;  %s3993_s4 = smov [#allocation7]  }
  0x49   : > { %s498_s18 = sshll.u32 %s3993_s4, 4  ;;  %s2626_s16 = sadd.s32 4294967294, %s3986_s28   ;;  %s499_s18 = int_to_ptr.vmem [resolvable:$true] %s498_s18 }
  0x4a   : > { %s660_s5 = scalar_lea.hbm %s4824_s10, %s3978_s26  ;;  %s66_s12 = sadd.s32 1, %s3966_s23 }
  0x4b   : > { %s662_s25 = sshll.u32 %s660_s5, 4  ;;  %s56_s5 = sadd.s32 1, %s3978_s26  ;;  %s663_s25 = int_to_ptr.hbm [resolvable:$true] %s662_s25 }
  0x4c   : > { %3320 = dma.hbm_to_vmem [thread:$0]  (!%p4181_p13), %s663_s25, 16, %s665_s13, %s4780_s30  }
  0x4d   : > { %s59_s25 = sadd.s32 1, %s3982_s27  ;;  %p57_p2 = scmp.ge.s32.totalorder %s56_s5, 2 }
  0x4e   : > { %s496_s17 = sshll.u32 %s4825_s2, 4  ;;  %p73_p3 = scmp.ne.s32.totalorder %s3966_s23, %s3962_s22  ;;  %s497_s17 = int_to_ptr.hbm [resolvable:$true] %s496_s17 }
  0x4f   : > { %3295 = dma.hbm_to_vmem [thread:$0]  (!%p4167_p11), %s497_s17, 128, %s499_s18, [#allocation6]  }
  0x50   : > { %p79_p5 = scmp.ne.s32.totalorder %s3962_s22, %s3958_s21  ;;  %s4875_s5 = smov (%p57_p2, %s56_s5), 0 }
  0x51   : > { %4826 = sst [smem:[#allocation40_spill]] %s4875_s5  ;;  %s4877_s25 = smov (!%p57_p2, %s59_s25), %s3982_s27 }
  0x52   : > { %p4254_p6 = por %p74_p0, %p73_p3  ;;  %p4263_p8 = por %p4779_p1, %p79_p5 }
  0x53   : > { %p61_p10 = scmp.ge.s32.totalorder %s4877_s25, 2  ;;  %s157_s11 = ssub.s32 %s3978_s26, %s4875_s5 }
  0x54   : > { %p158_p11 = scmp.eq.s32.totalorder %s157_s11, 0  ;;  %s160_s15 = sadd.s32 1, %s3954_s20 }
  0x55   : > { %s4879_s25 = smov (%p61_p10, %s4877_s25), 0  ;;  %p4282_p0 = por %p457_p4, %p73_p3 }
  0x56   : > { %4829 = sst [smem:[#allocation41_spill]] %s4879_s25  ;;  %s63_s4 = ssub.s32 %s3982_s27, %s4879_s25 }
  0x57   : > { %s4273_s17 = scalar_select %p158_p11, %s3954_s20, %s160_s15  }
  0x58   : > { %p64_p2 = scmp.eq.s32.totalorder %s63_s4, 0  ;;  %p463_p1 = scmp.eq.s32.totalorder %s2626_s16, 3 }
  0x59   : > { %4830 = sst [smem:[#allocation42_spill]] %s4273_s17  ;;  %s509_s30 = sand.u32 1, %s3966_s23  }
  0x5a   : > { %s3138_s11 = sshll.u32 %s3982_s27, 4  ;;  %p4294_p10 = por %p463_p1, %p79_p5 }
  0x5b   : > { %s4289_s7 = scalar_select %p64_p2, %s3966_s23, %s66_s12  }
  0x5c   : > { %s2631_s19 = sshll.u32 %s509_s30, 4  ;;  %s4834_s0 = sld [smem:[#allocation44_spill]] }
  0x5d   : > { %4832 = sst [smem:[#allocation43_spill]] %s4289_s7  ;;  %s513_s4 = scalar_lea.vmem [#allocation2], %s2631_s19 }
  0x5e   : > { %s522_s16 = sshll.u32 %s513_s4, 4  ;;  %p3297_p1 = pnand %p3333_p12, %p4254_p6  ;;  %s523_s16 = int_to_ptr.vmem [resolvable:$true] %s522_s16 }
  0x5f   : > { %s3253_s12 = smul.u32 192, %s4189_s24  ;;  %s510_s10 = scalar_lea.sflag [#allocation3], %s509_s30 }
  0x60   : > { %s3994_s25 = smov 128   ;;  %s3995_s5 = smov 8  }
  0x61   : > { %s3254_s27 = smul.u32 192, %s3978_s26  ;;  %s559_s2 = scalar_lea.vmem [#allocation10], %s3253_s12 }
  0x62   : > { %s519_s6 = scalar_lea.hbm %s4834_s0, %s3138_s11  ;;  %s2636_s9 = sshll.u32 %s4189_s24, 6 }
  0x63   : > { %s520_s8 = sshll.u32 %s519_s6, 4  ;;  %s567_s6 = sshll.u32 %s559_s2, 4  ;;  %s521_s8 = int_to_ptr.hbm [resolvable:$true] %s520_s8  ;;  %s568_s6 = int_to_ptr.vmem [resolvable:$true] %s567_s6 }
  0x64   : > { %3299 = dma.hbm_to_vmem [thread:$0]  (!%p3297_p1), %s521_s8, 256, %s523_s16, %s510_s10, %s3994_s25, %s3994_s25, %s3995_s5  }
  0x65   : > { %s4835_s3 = sld [smem:[#allocation49_spill]]  ;;  %s3139_s30 = sshll.u32 %s3978_s26, 6 }
  0x66   : > { %s4836_s7 = smov 4   ;;  %s4837_s8 = smov 64  }
  0x67   : > { %s4838_s10 = scalar_lea.sflag [#allocation9], %s4186_s1  ;;  %s4839_s16 = sld [smem:[#allocation51_spill]] }
  0x68   : > { %s602_s2 = scalar_lea.vmem [#allocation13], %s2636_s9  ;;  %s4840_s11 = scalar_lea.sflag [#allocation12], %s4186_s1 }
  0x69   : > { %s4841_s23 = sld [smem:[#allocation53_spill]]  ;;  %s2639_s9 = sshll.u32 %s4189_s24, 8 }
  0x6a   : > { %s4842_s5 = scalar_lea.sflag [#allocation15], %s4186_s1  ;;  %s3140_s25 = sshll.u32 %s3978_s26, 8 }
  0x6b   : > { %s564_s4 = scalar_lea.hbm %s4835_s3, %s3254_s27  ;;  %s610_s27 = sshll.u32 %s602_s2, 4  ;;  %s611_s27 = int_to_ptr.vmem [resolvable:$true] %s610_s27 }
  0x6c   : > { %s565_s0 = sshll.u32 %s564_s4, 4  ;;  %s4843_s2 = sld [smem:[#allocation55_spill]]  ;;  %s566_s0 = int_to_ptr.hbm [resolvable:$true] %s565_s0 }
  0x6d   : > { %3305 = dma.hbm_to_vmem [thread:$0]  (!%p4181_p13), %s566_s0, 3072, %s568_s6, %s4838_s10, %s4837_s8, %s4837_s8, %s4836_s7  }
  0x6e   : > { %s607_s12 = scalar_lea.hbm %s4839_s16, %s3139_s30  ;;  %s640_s6 = scalar_lea.vmem [#allocation16], %s4189_s24 }
  0x6f   : > { %s608_s19 = sshll.u32 %s607_s12, 4  ;;  %s643_s0 = scalar_lea.hbm %s4841_s23, %s3978_s26  ;;  %s609_s19 = int_to_ptr.hbm [resolvable:$true] %s608_s19 }
  0x70   : > { %3311 = dma.hbm_to_vmem [thread:$0]  (!%p4181_p13), %s609_s19, 1024, %s611_s27, %s4840_s11, %s4837_s8, %s4837_s8, %s4836_s7  }
  0x71   : > { %s647_s10 = sshll.u32 %s640_s6, 4  ;;  %s645_s30 = sshll.u32 %s643_s0, 4  ;;  %s648_s10 = int_to_ptr.vmem [resolvable:$true] %s647_s10  ;;  %s646_s30 = int_to_ptr.hbm [resolvable:$true] %s645_s30 }
  0x72   : > { %3317 = dma.hbm_to_vmem [thread:$0]  (!%p4181_p13), %s646_s30, 16, %s648_s10, %s4842_s5  }
  0x73   : > { %s680_s27 = scalar_lea.hbm %s4843_s2, %s3140_s25  ;;  %s675_s19 = scalar_lea.vmem [#allocation19], %s2639_s9 }
  0x74   : > { %s683_s23 = sshll.u32 %s675_s19, 4  ;;  %s681_s11 = sshll.u32 %s680_s27, 4  ;;  %s684_s23 = int_to_ptr.vmem [resolvable:$true] %s683_s23  ;;  %s682_s11 = int_to_ptr.hbm [resolvable:$true] %s681_s11 }
  0x75   : > { %s3996_s3 = smov 256   ;;  %s4844_s4 = smov 16  }
  0x76   : > { %s4845_s0 = scalar_lea.sflag [#allocation18], %s4186_s1  ;;  %s4846_s10 = sld [smem:[#allocation57_spill]] }
  0x77   : > { %3323 = dma.hbm_to_vmem [thread:$0]  (!%p4181_p13), %s682_s11, 4096, %s684_s23, %s4845_s0, %s3996_s3, %s3996_s3, %s4844_s4  }
  0x78   : > { %s704_s5 = scalar_lea.vmem [#allocation20], %s2639_s9  ;;  %s701_s16 = scalar_lea.sflag [#allocation21], %s4189_s24 }
  0x79   : > { %s712_s26 = sshll.u32 %s704_s5, 4  ;;  %s4360_s1 = sand.u32 (!%p4159_p9), 1, %s3962_s22   ;;  %s713_s26 = int_to_ptr.vmem [resolvable:$true] %s712_s26 }
  0x7a   : > { %730 = sbr.rel (%p4159_p9) target bundleno = 2012 (0x7dc), region = 80  ;;  %s2646_s17 = sshll.u32 (!%p4159_p9), %s4360_s1, 4 }
  0x7b   : > { %s733_s9 = scalar_lea.sflag (!%p4159_p9), [#allocation3], %s4360_s1 }
  0x7c   : > { %s709_s30 = scalar_lea.hbm %s4846_s10, %s3140_s25  ;;  %s4366_s25 = scalar_lea.vmem (!%p4159_p9), [#allocation2], %s2646_s17 }
  0x7d   : > { %s710_s20 = sshll.u32 %s709_s30, 4  ;;  %s711_s20 = int_to_ptr.hbm [resolvable:$true] %s710_s20 }
  0x7e   : > { %3326 = dma.hbm_to_vmem [thread:$0]  (!%p4181_p13), %s711_s20, 4096, %s713_s26, %s701_s16, %s4837_s8, %s4837_s8, %s4836_s7  }
  0x7f   : > { %3913 = dma.done.wait (%p4263_p8), %s733_s9, 256  }
  0x80   : > { %3915 = vsyncadd (%p4263_p8), %s733_s9, 4294967040  ;;  %p4848_p4 = scmp.eq.s32.totalorder %s4134_s29, 0 }
  0x82   : > { %3917 = dma.done.wait (%p4848_p4), [#allocation6], 1664   ;;  %p4849_p9 = pmov %p4848_p4 }
  0x83   : > { %s4850_s7 = sld [smem:[#allocation31_spill]]  ;;  %s752_s24 = sand.u32 1, %s4134_s29  }
  0x84   : > { %3919 = vsyncadd (%p4849_p9), [#allocation6], 4294965632  ;;  %s753_s14 = scalar_lea.sflag [#allocation9], %s752_s24 }
  0x89   : > { %s4378_s26 = sand.u32 1, %s4850_s7  }
  0x8a   : > { %s755_s8 = scalar_lea.vmem [#allocation8], %s4378_s26 }
  0x8b   : > { %3921 = dma.done.wait (%p4151_p7), %s753_s14, 3088  }
  0x8c   : > { %3923 = vsyncadd (%p4151_p7), %s753_s14, 4294964208  ;;  %s3257_s13 = smul.u32 192, %s4378_s26  ;;  %s772_s19 = scalar_lea.sflag [#allocation12], %s752_s24 }
  0x8d   : > { %s3258_s2 = smul.u32 3, %s4378_s26 }
  0x8e   : > { %s4387_s27 = scalar_lea.vmem [#allocation10], %s3257_s13 }
  0x8f   : > { %s4389_s23 = scalar_lea.vmem [#allocation11], %s3258_s2 }
  0x90   : > { %3925 = dma.done.wait (%p4151_p7), %s772_s19, 1072  }
  0x91   : > { %3927 = vsyncadd (%p4151_p7), %s772_s19, 4294966224  ;;  %s2649_s29 = sshll.u32 %s4378_s26, 6  ;;  %s792_s3 = scalar_lea.sflag [#allocation15], %s752_s24 }
  0x92   : > { %s4396_s11 = scalar_lea.vmem [#allocation13], %s2649_s29 }
  0x93   : > { %3929 = dma.done.wait (%p4151_p7), %s792_s3, 32  }
  0x94   : > { %3931 = vsyncadd (%p4151_p7), %s792_s3, 4294967264  ;;  %s810_s6 = scalar_lea.sflag [#allocation18], %s752_s24 }
  0x95   : > { %3933 = dma.done.wait (%p4151_p7), %s810_s6, 4112  }
  0x96   : > { %3935 = vsyncadd (%p4151_p7), %s810_s6, 4294963184  ;;  %s2650_s30 = sshll.u32 %s4378_s26, 8  ;;  %s829_s16 = scalar_lea.sflag [#allocation21], %s4378_s26 }
  0x97   : > { %s4410_s5 = scalar_lea.vmem [#allocation19], %s2650_s30  ;;  %s4413_s12 = scalar_lea.vmem [#allocation20], %s2650_s30 }
  0x98   : > { %3937 = dma.done.wait (%p4151_p7), %s829_s16, 4096  }
  0x99   : > { %3939 = vsyncadd (%p4151_p7), %s829_s16, 4294963200  ;;  %s4852_s9 = sld [smem:[#allocation34_spill]]  ;;  %s4439_s4 = scalar_lea.vmem [#allocation22], %s2646_s17 }
  0x9a   : > { %s4853_s13 = sld [smem:[#allocation47_spill]] }
  0x9b   : > { %s4854_s6 = sld [smem:[#allocation56_spill]] }
  0x9c   : > { %s4855_s10 = sld [smem:[#allocation58_spill]] }
  0x9f   : > { %p932_p12 = scmp.lt.s32.totalorder %s4852_s9, 1  ;;  %p2654_p7 = scmp.ne.s32.totalorder %s4852_s9, 0 }
  0xa1   : > { %s4421_s7 = scalar_select %p932_p12, %s4852_s9, 1 }
  0xa2   : > { %947 = sbr.rel (%p2654_p7) target bundleno = 338 (0x152), region = 132 }
  0xa3   : > { %s934_s2 = scalar_lea.vmem %s4853_s13, %s4421_s7  ;;  %s2653_s19 = sshll.u32 %s4421_s7, 2 }
  0xa4   : > { %s4431_s30 = scalar_lea.vmem %s4854_s6, %s2653_s19  ;;  %s941_s0 = scalar_lea.vmem %s4855_s10, %s4421_s7 }
  0xa7   : > { %v3151_v0 = vld [vmem:[#allocation5 + $0x38] sm:$0xff]  ;;  %v3150_v2 = vld [vmem:[#allocation5 + $0x30] sm:$0xff]  ;;  %v3149_v4 = vld [vmem:[#allocation5 + $0x28] sm:$0xff]  ;;  %vm1055_vm0 = vcmask 523264  }
  0xa8   : > { %v3155_v1 = vld [vmem:[#allocation5 + $0x58] sm:$0xff]  ;;  %1059 = vmatpush.bf16.msra.mxu0 %v3151_v0  ;;  %v3154_v3 = vld [vmem:[#allocation5 + $0x50] sm:$0xff]  ;;  %v3153_v5 = vld [vmem:[#allocation5 + $0x48] sm:$0xff] }
  0xa9   : > { %1077 = vmatpush.bf16.msra.mxu1 %v3155_v1  ;;  %v3148_v6 = vld [vmem:[#allocation5 + $0x20] sm:$0xff]  ;;  %v2659_v9 = vld [vmem:[%s4366_s25 + $0x8] sm:$0xf0]  ;;  %v3146_v12 = vld [vmem:[#allocation5 + $0x10] sm:$0xff] }
  0xaa   : > { %v3152_v7 = vld [vmem:[#allocation5 + $0x40] sm:$0xff]  ;;  %v3147_v10 = vld [vmem:[#allocation5 + $0x18] sm:$0xff]  ;;  %v3145_v13 = vld [vmem:[#allocation5 + $0x8] sm:$0xff] }
  0xab   : > { %v3142_v8 = vld [vmem:[%s4366_s25 + $0x4] sm:$0xf]  ;;  %v2657_v15 = vld [vmem:[%s4366_s25] sm:$0xf]  ;;  %v3143_v16 = vld [vmem:[%s4366_s25 + $0x4] sm:$0xf0] }
  0xac   : > { %1060 = vmatpush.bf16.msra.mxu0 %v3150_v2  ;;  %v2662_v11 = vor.u32 %v3142_v8, %v2659_v9  ;;  %v3144_v14 = vld [vmem:[#allocation5] sm:$0xff]  ;;  %v2658_v17 = vor.u32 %v3143_v16, %v2657_v15 }
  0xad   : > { %1078 = vmatpush.bf16.msra.mxu1 %v3154_v3  ;;  %v1087_v20 = vld [vmem:[#allocation7] sm:$0xff] }
  0xb0   : > { %1061 = vmatpush.bf16.msra.mxu0 %v3149_v4 }
  0xb1   : > { %1079 = vmatpush.bf16.msra.mxu1 %v3153_v5 }
  0xb4   : > { %1062 = vmatpush.bf16.msra.mxu0 %v3148_v6 }
  0xb5   : > { %1080 = vmatpush.bf16.msra.mxu1 %v3152_v7 }
  0xb8   : > { %1063 = vmatpush.bf16.msra.mxu0 %v3147_v10  ;;  %2711 = vmatmul.msk.bf16.vlgmr.msra.gmra.mxu1 %vm1055_vm0, %v2662_v11 }
  0xbc   : > { %1064 = vmatpush.bf16.msra.mxu0 %v3146_v12 }
  0xc0   : > { %1065 = vmatpush.bf16.msra.mxu0 %v3145_v13 }
  0xc4   : > { %1066 = vmatpush.bf16.msra.mxu0 %v3144_v14 }
  0xc7   : > { %1067 = vmatmul.bf16.vlgmr.msra.gmra.mxu0 %v2658_v17 }
 0x135   : > { %v1082_v18 = vpop.f32.mrf.mxu1 }
 0x13d   : > { %v1084_v23 = vpop.f32.mrf.mxu1 }
 0x144   : > { %v1068_v19 = vpop.f32.mrf.mxu0 }
 0x145   : > { %v1083_v21 = vadd.f32 %v1082_v18, %v1068_v19 }
 0x147   : > { %v1088_v22 = vadd.f32 %v1087_v20, %v1083_v21 }
 0x149   : > { %1090 = vst [vmem:[%s4439_s4] sm:$0xff] %v1088_v22 }
 0x14c   : > { %v1070_v24 = vpop.f32.mrf.mxu0 }
 0x14d   : > { %v1085_v25 = vadd.f32 %v1084_v23, %v1070_v24 }
 0x14f   : > { %v1089_v26 = vadd.f32 %v1087_v20, %v1085_v25 }
 0x151   : > { %1091 = vst [vmem:[%s4439_s4 + $0x8] sm:$0xff] %v1089_v26 }
 0x152 PF: > { %v4449_v27 = vld [vmem:[%s4439_s4] sm:$0xff]  ;;  %v3997_v29 = vmov 128.0   ;;  %v3437_v23 = vld [vmem:[%s934_s2] ss:$0 sm:$0xff]  ;;  %vm1469_vm8 = vcmask 1043456   ;;  %vm1441_vm10 = vcmask 64512  }
 0x153   : > { %1096 = vadd.xlane.f32.xlu0 %v4449_v27  ;;  %3446 = vrcp.f32 %v3997_v29  ;;  %v3163_v44 = vld [vmem:[%s4387_s27 + $0x38] sm:$0xff]  ;;  %v3162_v47 = vld [vmem:[%s4387_s27 + $0x30] sm:$0xff]  ;;  %v3161_v50 = vld [vmem:[%s4387_s27 + $0x28] sm:$0xff]  ;;  %s2310_s13 = sshll.u32 %s4439_s4, 4  ;;  %s2298_s19 = scalar_lea.sflag [#allocation4], %s4360_s1  ;;  %s2311_s13 = int_to_ptr.vmem [resolvable:$true] %s2310_s13 }
 0x154   : > { %v3171_v45 = vld [vmem:[%s4387_s27 + $0x78] sm:$0xff]  ;;  %1222 = vmatpush.bf16.msra.mxu0 %v3163_v44  ;;  %v3170_v48 = vld [vmem:[%s4387_s27 + $0x70] sm:$0xff]  ;;  %v3169_v51 = vld [vmem:[%s4387_s27 + $0x68] sm:$0xff] }
 0x155   : > { %v3179_v46 = vld [vmem:[%s4387_s27 + $0xb8] sm:$0xff]  ;;  %1306 = vmatpush.bf16.msra.mxu1 %v3171_v45  ;;  %v3178_v49 = vld [vmem:[%s4387_s27 + $0xb0] sm:$0xff]  ;;  %v3177_v52 = vld [vmem:[%s4387_s27 + $0xa8] sm:$0xff] }
 0x156   : > { %1390 = vmatpush.bf16.msra.mxu2 %v3179_v46  ;;  %v3160_v53 = vld [vmem:[%s4387_s27 + $0x20] sm:$0xff]  ;;  %v3159_v56 = vld [vmem:[%s4387_s27 + $0x18] sm:$0xff]  ;;  %v3158_v59 = vld [vmem:[%s4387_s27 + $0x10] sm:$0xff] }
 0x157   : > { %v3168_v54 = vld [vmem:[%s4387_s27 + $0x60] sm:$0xff]  ;;  %v3167_v57 = vld [vmem:[%s4387_s27 + $0x58] sm:$0xff]  ;;  %v3166_v60 = vld [vmem:[%s4387_s27 + $0x50] sm:$0xff] }
 0x158   : > { %v4453_v28 = vld [vmem:[%s4439_s4 + $0x8] sm:$0xff]  ;;  %1223 = vmatpush.bf16.msra.mxu0 %v3162_v47 }
 0x159   : > { %v3447_v30 = vpop.eup %3446  ;;  %1307 = vmatpush.bf16.msra.mxu1 %v3170_v48  ;;  %v3176_v55 = vld [vmem:[%s4387_s27 + $0xa0] sm:$0xff]  ;;  %v3175_v58 = vld [vmem:[%s4387_s27 + $0x98] sm:$0xff]  ;;  %v3174_v61 = vld [vmem:[%s4387_s27 + $0x90] sm:$0xff] }
 0x15a   : > { %v1101_v31 = vmul.f32 128.0, %v3447_v30  ;;  %vm1105_vm1 = vweird.f32 %v3447_v30  ;;  %1391 = vmatpush.bf16.msra.mxu2 %v3178_v49  ;;  %v3157_v62 = vld [vmem:[%s4387_s27 + $0x8] sm:$0xff]  ;;  %v3156_v2 = vld [vmem:[%s4387_s27] sm:$0xff] }
 0x15b   : > { %1098 = vadd.xlane.f32.xlu0 %v4453_v28  ;;  %v3165_v63 = vld [vmem:[%s4387_s27 + $0x48] sm:$0xff]  ;;  %v3164_v3 = vld [vmem:[%s4387_s27 + $0x40] sm:$0xff] }
 0x15c   : > { %v1102_v32 = vsub.f32 1.0, %v1101_v31  ;;  %1224 = vmatpush.bf16.msra.mxu0 %v3161_v50  ;;  %v3173_v0 = vld [vmem:[%s4387_s27 + $0x88] sm:$0xff]  ;;  %v3172_v5 = vld [vmem:[%s4387_s27 + $0x80] sm:$0xff] }
 0x15d   : > { %1308 = vmatpush.bf16.msra.mxu1 %v3169_v51 }
 0x15e   : > { %v1103_v33 = vmul.f32 %v3447_v30, %v1102_v32  ;;  %1392 = vmatpush.bf16.msra.mxu2 %v3177_v52 }
 0x160   : > { %v1104_v34 = vadd.f32 %v3447_v30, %v1103_v33  ;;  %1225 = vmatpush.bf16.msra.mxu0 %v3160_v53 }
 0x161   : > { %1309 = vmatpush.bf16.msra.mxu1 %v3168_v54 }
 0x162   : > { %v4456_v35 = vsel %vm1105_vm1, %v3447_v30, %v1104_v34  ;;  %1393 = vmatpush.bf16.msra.mxu2 %v3176_v55  ;;  %v3438_v30 = vld [vmem:[%s755_s8] ss:$0 sm:$0xff]  ;;  %s4857_s8 = scalar_lea.vmem [#allocation14], %s4378_s26 }
 0x164   : > { %1226 = vmatpush.bf16.msra.mxu0 %v3159_v56 }
 0x165   : > { %1310 = vmatpush.bf16.msra.mxu1 %v3167_v57 }
 0x166   : > { %1394 = vmatpush.bf16.msra.mxu2 %v3175_v58 }
 0x168   : > { %1227 = vmatpush.bf16.msra.mxu0 %v3158_v59  ;;  %v1436_v59 = vlaneseq }
 0x169   : > { %1311 = vmatpush.bf16.msra.mxu1 %v3166_v60 }
 0x16a   : > { %1395 = vmatpush.bf16.msra.mxu2 %v3174_v61  ;;  %v1437_v60 = vand.u32 127, %v1436_v59 }
 0x16c   : > { %1228 = vmatpush.bf16.msra.mxu0 %v3157_v62  ;;  %vm1438_vm9 = vcmp.lt.s32.totalorder %v1437_v60, 5 }
 0x16d   : > { %1312 = vmatpush.bf16.msra.mxu1 %v3165_v63 }
 0x16e   : > { %1396 = vmatpush.bf16.msra.mxu2 %v3173_v0 }
 0x170   : > { %1229 = vmatpush.bf16.msra.mxu0 %v3156_v2 }
 0x171   : > { %1313 = vmatpush.bf16.msra.mxu1 %v3164_v3 }
 0x172   : > { %1397 = vmatpush.bf16.msra.mxu2 %v3172_v5 }
 0x1c6   : > { %v1097_v36 = vpop.xlane.xlu0 %1096 }
 0x1c7   : > { %v1107_v37 = vmul.f32 %v4456_v35, %v1097_v36  ;;  %v3440_v36 = vld [vmem:[%s4389_s23 + $0x1] ss:$0 sm:$0xff] }
 0x1c9   : > { %v4460_v38 = vsub.f32 %v4449_v27, %v1107_v37 }
 0x1cb   : > { %v1111_v39 = vmul.f32 %v4460_v38, %v4460_v38 }
 0x1cd   : > { %1113 = vadd.xlane.f32.xlu1 %v1111_v39  ;;  %v3439_v39 = vld [vmem:[%s4389_s23] ss:$0 sm:$0xff] }
 0x1ce   : > { %v1099_v40 = vpop.xlane.xlu0 %1098 }
 0x1cf   : > { %v1108_v41 = vmul.f32 %v4456_v35, %v1099_v40 }
 0x1d1   : > { %v4466_v42 = vsub.f32 %v4453_v28, %v1108_v41 }
 0x1d3   : > { %v1112_v43 = vmul.f32 %v4466_v42, %v4466_v42 }
 0x1d5   : > { %1115 = vadd.xlane.f32.xlu1 %v1112_v43  ;;  %v3441_v43 = vld [vmem:[%s4389_s23 + $0x2] ss:$0 sm:$0xff]  ;;  %s4858_s23 = scalar_lea.vmem [#allocation16], %s4378_s26 }
 0x240   : > { %v1114_v1 = vpop.xlane.xlu1 %1113 }
 0x241   : > { %v1117_v4 = vmul.f32 %v1114_v1, %v4456_v35 }
 0x243   : > { %v1119_v6 = vadd.f32 1e-05, %v1117_v4 }
 0x245   : > { %3448 = vrsqrt.f32 %v1119_v6  ;;  %vm1127_vm3 = vweird.f32 %v1119_v6 }
 0x248   : > { %v1116_v7 = vpop.xlane.xlu1 %1115 }
 0x249   : > { %v1118_v8 = vmul.f32 %v1116_v7, %v4456_v35 }
 0x24b   : > { %v3449_v9 = vpop.eup %3448  ;;  %v1120_v10 = vadd.f32 1e-05, %v1118_v8 }
 0x24c   : > { %v1122_v11 = vmul.f32 %v3449_v9, %v1119_v6  ;;  %vm1128_vm2 = vweird.f32 %v3449_v9 }
 0x24d   : > { %3450 = vrsqrt.f32 %v1120_v10  ;;  %vm1129_vm4 = vmor %vm1127_vm3, %vm1128_vm2  ;;  %vm1137_vm6 = vweird.f32 %v1120_v10 }
 0x24e   : > { %v1123_v12 = vmul.f32 %v3449_v9, %v1122_v11 }
 0x250   : > { %v1124_v13 = vmul.f32 0.5, %v1123_v12 }
 0x252   : > { %v1125_v14 = vsub.f32 1.5, %v1124_v13 }
 0x253   : > { %v3451_v15 = vpop.eup %3450 }
 0x254   : > { %v1126_v16 = vmul.f32 %v3449_v9, %v1125_v14  ;;  %v1132_v17 = vmul.f32 %v3451_v15, %v1120_v10  ;;  %vm1138_vm5 = vweird.f32 %v3451_v15 }
 0x255   : > { %vm1139_vm7 = vmor %vm1137_vm6, %vm1138_vm5 }
 0x256   : > { %v1133_v18 = vmul.f32 %v3451_v15, %v1132_v17  ;;  %v1130_v19 = vsel %vm1129_vm4, %v3449_v9, %v1126_v16  ;;  %v3186_v16 = vld [vmem:[%s4396_s11 + $0x30] sm:$0xff] }
 0x257   : > { %v1141_v22 = vmul.f32 %v1130_v19, %v4460_v38  ;;  %v3184_v19 = vld [vmem:[%s4396_s11 + $0x20] sm:$0xff] }
 0x258   : > { %v1134_v20 = vmul.f32 0.5, %v1133_v18  ;;  %v3185_v18 = vld [vmem:[%s4396_s11 + $0x28] sm:$0xff] }
 0x259   : > { %v1146_v29 = vmul.f32 %v3437_v23, %v1141_v22 }
 0x25a   : > { %v1135_v21 = vsub.f32 1.5, %v1134_v20 }
 0x25b   : > { %v1151_v32 = vadd.f32 %v3438_v30, %v1146_v29 }
 0x25c   : > { %v1136_v24 = vmul.f32 %v3451_v15, %v1135_v21 }
 0x25e   : > { %v1140_v25 = vsel %vm1139_vm7, %v3451_v15, %v1136_v24  ;;  %v3187_v15 = vld [vmem:[%s4396_s11 + $0x38] sm:$0xff] }
 0x25f   : > { %v1142_v26 = vmul.f32 %v1140_v25, %v4466_v42  ;;  %1574 = vmatpush.bf16.msrb.mxu1 %v3187_v15 }
 0x261   : > { %v1147_v31 = vmul.f32 %v3437_v23, %v1142_v26  ;;  %v3183_v23 = vld [vmem:[%s4396_s11 + $0x18] sm:$0xff] }
 0x263   : > { %v1152_v33 = vadd.f32 %v3438_v30, %v1147_v31  ;;  %1575 = vmatpush.bf16.msrb.mxu1 %v3186_v16  ;;  %v3182_v30 = vld [vmem:[%s4396_s11 + $0x10] sm:$0xff]  ;;  %v3181_v31 = vld [vmem:[%s4396_s11 + $0x8] sm:$0xff]  ;;  %v2960_v16 = vld [vmem:[%s4410_s5 + $0xb0] sm:$0xf0] }
 0x265   : > { %v1153_v34 = vpack.c.bf16 %v1152_v33, %v1151_v32  ;;  %v3180_v32 = vld [vmem:[%s4396_s11] sm:$0xff]  ;;  %s4859_s11 = scalar_lea.vmem [#allocation17], %s4378_s26  ;;  %s4860_s26 = sld [smem:[#allocation35_spill]] }
 0x267   : > { %1230 = vmatmul.bf16.vlgmr.msra.gmra.mxu0 %v1153_v34  ;;  %1314 = vmatmul.bf16.vlgmr.msra.gmra.mxu1 %v1153_v34 }
 0x268   : > { %1398 = vmatmul.bf16.vlgmr.msra.gmra.mxu2 %v1153_v34  ;;  %1576 = vmatpush.bf16.msrb.mxu1 %v3185_v18  ;;  %v3211_v18 = vld [vmem:[%s4410_s5 + $0xb4] sm:$0xf0] }
 0x26b   : > { %s3252_s9 = sshll.u32 %s4860_s26, 4 }
 0x26c   : > { %1577 = vmatpush.bf16.msrb.mxu1 %v3184_v19 }
 0x270   : > { %1578 = vmatpush.bf16.msrb.mxu1 %v3183_v23 }
 0x274   : > { %1579 = vmatpush.bf16.msrb.mxu1 %v3182_v30  ;;  %v2944_v30 = vld [vmem:[%s4410_s5 + $0x90] sm:$0xf0] }
 0x278   : > { %1580 = vmatpush.bf16.msrb.mxu1 %v3181_v31  ;;  %v2950_v31 = vld [vmem:[%s4410_s5 + $0x88] sm:$0xf] }
 0x27c   : > { %1581 = vmatpush.bf16.msrb.mxu1 %v3180_v32  ;;  %v3207_v32 = vld [vmem:[%s4410_s5 + $0x94] sm:$0xf0] }
 0x2e4   : > { %v1315_v37 = vpop.f32.mrf.mxu1  ;;  %v1231_v40 = vpop.f32.mrf.mxu0 }
 0x2e5   : > { %v1316_v38 = vadd.f32 %v3440_v36, %v1315_v37  ;;  %v1232_v42 = vadd.f32 %v3439_v39, %v1231_v40 }
 0x2e7   : > { %v1406_v41 = vpack.c.bf16 %v1316_v38, %v1316_v38  ;;  %v1404_v48 = vpack.c.bf16 %v1232_v42, %v1232_v42 }
 0x2e9   : > { %1417 = vmatpush.bf16.xpose.msra.mxu3 %v1406_v41 }
 0x2eb   : > { %v1399_v44 = vpop.f32.mrf.mxu2 }
 0x2ec   : > { %v1400_v45 = vadd.f32 %v3441_v43, %v1399_v44  ;;  %v1317_v46 = vpop.f32.mrf.mxu1  ;;  %v1233_v55 = vpop.f32.mrf.mxu0 }
 0x2ed   : > { %v1318_v47 = vadd.f32 %v3440_v36, %v1317_v46  ;;  %v1234_v57 = vadd.f32 %v3439_v39, %v1233_v55  ;;  %v3442_v39 = vld [vmem:[%s4857_s8] ss:$0 sm:$0xff] }
 0x2ee   : > { %v1408_v49 = vpack.c.bf16 %v1400_v45, %v1400_v45 }
 0x2ef   : > { %v1407_v50 = vpack.c.bf16 %v1318_v47, %v1318_v47  ;;  %v1405_v58 = vpack.c.bf16 %v1234_v57, %v1234_v57  ;;  %v2998_v57 = vld [vmem:[%s4410_s5 + $0xe8] sm:$0xf] }
 0x2f0   : > { %1418 = vmatmul.bf16.vlgmr.msra.gmra.mxu3 %v1404_v48  ;;  %v1471_v51 = vsel %vm1469_vm8, %v1408_v49, 0 }
 0x2f1   : > { %1430 = vmatpush.bf16.xpose.msrb.mxu3 %v1407_v50 }
 0x2f3   : > { %v1401_v52 = vpop.f32.mrf.mxu2 }
 0x2f4   : > { %v1402_v53 = vadd.f32 %v3441_v43, %v1401_v52  ;;  %v2990_v52 = vld [vmem:[%s4410_s5 + $0xe0] sm:$0xf] }
 0x2f6   : > { %v1409_v54 = vpack.c.bf16 %v1402_v53, %v1402_v53  ;;  %v3218_v53 = vld [vmem:[%s4410_s5 + $0xec] sm:$0xf0] }
 0x2f7   : > { %v2991_v55 = vor.u32 %v3218_v53, %v2990_v52  ;;  %v2910_v53 = vld [vmem:[%s4410_s5 + $0x40] sm:$0xf] }
 0x2f8   : > { %v1490_v56 = vsel %vm1469_vm8, %v1409_v54, 0  ;;  %v3216_v54 = vld [vmem:[%s4410_s5 + $0xe4] sm:$0xf] }
 0x2f9   : > { %1480 = vmatpush.bf16.msra.mxu3 %v1471_v51  ;;  %1499 = vmatpush.bf16.msrb.mxu0 %v1490_v56  ;;  %v2992_v56 = vld [vmem:[%s4410_s5 + $0xf0] sm:$0xf0] }
 0x2fa   : > { %v2995_v59 = vor.u32 %v3216_v54, %v2992_v56  ;;  %1845 = vmatpush.bf16.msrb.mxu2 %v2991_v55  ;;  %v3198_v54 = vld [vmem:[%s4410_s5 + $0x4c] sm:$0xf0]  ;;  %v3196_v55 = vld [vmem:[%s4410_s5 + $0x44] sm:$0xf] }
 0x2fb   : > { %v2911_v56 = vor.u32 %v3198_v54, %v2910_v53  ;;  %v3444_v53 = vld [vmem:[%s4859_s11] ss:$0 sm:$0xff] }
 0x300   : > { %1431 = vmatmul.bf16.vlgmr.msrb.gmra.mxu3 %v1405_v58  ;;  %v3219_v58 = vld [vmem:[%s4410_s5 + $0xf4] sm:$0xf0] }
 0x301   : > { %v2999_v60 = vor.u32 %v3219_v58, %v2998_v57  ;;  %1859 = vmatpush.bf16.msrb.mxu3 %v2995_v59  ;;  %v2912_v57 = vld [vmem:[%s4410_s5 + $0x50] sm:$0xf0]  ;;  %v2918_v58 = vld [vmem:[%s4410_s5 + $0x48] sm:$0xf]  ;;  %v3199_v59 = vld [vmem:[%s4410_s5 + $0x54] sm:$0xf0] }
 0x303   : > { %1873 = vmatpush.bf16.msra.mxu0 %v2999_v60  ;;  %v2915_v60 = vor.u32 %v3196_v55, %v2912_v57  ;;  %v3243_v57 = vld [vmem:[%s4413_s12 + $0xb8] sm:$0xff] }
 0x373   : > { %v1419_v61 = vpop.f32.mrf.mxu3 }
 0x374   : > { %v1439_v62 = vsel %vm1438_vm9, %v1419_v61, -1e+30  ;;  %v3217_v61 = vld [vmem:[%s4410_s5 + $0xec] sm:$0xf] }
 0x375   : > { %v1442_v63 = vsel %vm1441_vm10, %v1439_v62, -inf }
 0x376   : > { %1443 = vmax.xlane.f32.xlu2 %v1442_v63 }
 0x37b   : > { %v1421_v0 = vpop.f32.mrf.mxu3 }
 0x37c   : > { %v2974_v0 = vld [vmem:[%s4410_s5 + $0xc0] sm:$0xf] }
 0x383   : > { %v1432_v1 = vpop.f32.mrf.mxu3 }
 0x384   : > { %v1440_v2 = vsel %vm1438_vm9, %v1432_v1, -1e+30  ;;  %v3214_v1 = vld [vmem:[%s4410_s5 + $0xcc] sm:$0xf0] }
 0x385   : > { %v1445_v3 = vsel %vm1441_vm10, %v1440_v2, -inf }
 0x386   : > { %1446 = vmax.xlane.f32.xlu2 %v1445_v3  ;;  %v2975_v3 = vor.u32 %v3214_v1, %v2974_v0  ;;  %v2894_v1 = vld [vmem:[%s4410_s5 + $0x20] sm:$0xf] }
 0x388   : > { %1846 = vmatpush.bf16.msrb.mxu2 %v2975_v3  ;;  %v3192_v3 = vld [vmem:[%s4410_s5 + $0x24] sm:$0xf] }
 0x38b   : > { %v1434_v4 = vpop.f32.mrf.mxu3 }
 0x38c   : > { %v2976_v4 = vld [vmem:[%s4410_s5 + $0xd0] sm:$0xf0] }
 0x3e9   : > { %v1444_v5 = vpop.xlane.xlu2 %1443 }
 0x3ea   : > { %v1448_v6 = vsub.f32 %v1439_v62, %v1444_v5  ;;  %v3000_v62 = vld [vmem:[%s4410_s5 + $0xf8] sm:$0xf0]  ;;  %v2982_v5 = vld [vmem:[%s4410_s5 + $0xc8] sm:$0xf] }
 0x3eb   : > { %v3003_v63 = vor.u32 %v3217_v61, %v3000_v62  ;;  %v2919_v61 = vor.u32 %v3199_v59, %v2918_v58  ;;  %v3197_v62 = vld [vmem:[%s4410_s5 + $0x4c] sm:$0xf]  ;;  %v3251_v58 = vld [vmem:[%s4413_s12 + $0xf8] sm:$0xff]  ;;  %v3250_v59 = vld [vmem:[%s4413_s12 + $0xf0] sm:$0xff] }
 0x3ec   : > { %v1450_v7 = vmul.f32 1.442695, %v1448_v6  ;;  %v3215_v6 = vld [vmem:[%s4410_s5 + $0xd4] sm:$0xf0] }
 0x3ed   : > { %1887 = vmatpush.bf16.msra.mxu1 %v3003_v63  ;;  %v2920_v63 = vld [vmem:[%s4410_s5 + $0x58] sm:$0xf0] }
 0x3ee   : > { %3452 = vpow2.f32 %v1450_v7  ;;  %v2923_v0 = vor.u32 %v3197_v62, %v2920_v63  ;;  %v3241_v62 = vld [vmem:[%s4413_s12 + $0xa8] sm:$0xff] }
 0x3ef   : > { %v3249_v63 = vld [vmem:[%s4413_s12 + $0xe8] sm:$0xff] }
 0x3f4   : > { %v3453_v8 = vpop.eup %3452 }
 0x3f5   : > { %v1454_v9 = vsel %vm1441_vm10, %v3453_v8, 0.0 }
 0x3f6   : > { %1455 = vadd.xlane.f32.xlu0 %v1454_v9  ;;  %v3213_v9 = vld [vmem:[%s4410_s5 + $0xcc] sm:$0xf] }
 0x3f9   : > { %v1447_v10 = vpop.xlane.xlu2 %1446 }
 0x3fa   : > { %v1449_v11 = vsub.f32 %v1440_v2, %v1447_v10  ;;  %v3212_v2 = vld [vmem:[%s4410_s5 + $0xc4] sm:$0xf]  ;;  %v2984_v10 = vld [vmem:[%s4410_s5 + $0xd8] sm:$0xf0] }
 0x3fb   : > { %v2979_v7 = vor.u32 %v3212_v2, %v2976_v4  ;;  %v3194_v2 = vld [vmem:[%s4410_s5 + $0x2c] sm:$0xf0] }
 0x3fc   : > { %v1452_v12 = vmul.f32 1.442695, %v1449_v11  ;;  %v2987_v11 = vor.u32 %v3213_v9, %v2984_v10  ;;  %v2895_v4 = vor.u32 %v3194_v2, %v2894_v1  ;;  %v3234_v1 = vld [vmem:[%s4413_s12 + $0x70] sm:$0xff]  ;;  %v3240_v2 = vld [vmem:[%s4413_s12 + $0xa0] sm:$0xff] }
 0x3fd   : > { %1860 = vmatpush.bf16.msrb.mxu3 %v2979_v7  ;;  %v3195_v7 = vld [vmem:[%s4410_s5 + $0x34] sm:$0xf0] }
 0x3fe   : > { %3454 = vpow2.f32 %v1452_v12  ;;  %v2958_v12 = vld [vmem:[%s4410_s5 + $0xa0] sm:$0xf]  ;;  %1888 = vmatpush.bf16.msra.mxu1 %v2987_v11  ;;  %v3193_v11 = vld [vmem:[%s4410_s5 + $0x2c] sm:$0xf] }
 0x404   : > { %v3455_v13 = vpop.eup %3454 }
 0x405   : > { %v1457_v14 = vsel %vm1441_vm10, %v3455_v13, 0.0 }
 0x406   : > { %1458 = vadd.xlane.f32.xlu1 %v1457_v14  ;;  %v3208_v14 = vld [vmem:[%s4410_s5 + $0xa4] sm:$0xf] }
 0x407   : > { %v2963_v19 = vor.u32 %v3208_v14, %v2960_v16  ;;  %v3190_v16 = vld [vmem:[%s4410_s5 + $0xc] sm:$0xf0] }
 0x409   : > { %1861 = vmatpush.bf16.msrb.mxu3 %v2963_v19 }
 0x469   : > { %v1456_v17 = vpop.xlane.xlu0 %1455 }
 0x46a   : > { %3456 = vrcp.f32 %v1456_v17  ;;  %v2966_v17 = vld [vmem:[%s4410_s5 + $0xa8] sm:$0xf] }
 0x470   : > { %v3457_v20 = vpop.eup %3456 }
 0x471   : > { %v1462_v21 = vmul.f32 %v3457_v20, %v3453_v8  ;;  %v2983_v8 = vor.u32 %v3215_v6, %v2982_v5  ;;  %v2967_v20 = vor.u32 %v3211_v18, %v2966_v17  ;;  %v2896_v5 = vld [vmem:[%s4410_s5 + $0x30] sm:$0xf0]  ;;  %v2902_v6 = vld [vmem:[%s4410_s5 + $0x28] sm:$0xf]  ;;  %v3188_v17 = vld [vmem:[%s4410_s5 + $0x4] sm:$0xf] }
 0x472   : > { %v2899_v9 = vor.u32 %v3192_v3, %v2896_v5  ;;  %v2903_v10 = vor.u32 %v3195_v7, %v2902_v6  ;;  %v2880_v18 = vld [vmem:[%s4410_s5 + $0x10] sm:$0xf0]  ;;  %v3248_v3 = vld [vmem:[%s4413_s12 + $0xe0] sm:$0xff]  ;;  %v3233_v5 = vld [vmem:[%s4413_s12 + $0x68] sm:$0xff] }
 0x473   : > { %v1464_v22 = vpack.c.bf16 %v1462_v21, %v1462_v21  ;;  %1874 = vmatpush.bf16.msra.mxu0 %v2983_v8  ;;  %v3209_v21 = vld [vmem:[%s4410_s5 + $0xac] sm:$0xf]  ;;  %v3239_v6 = vld [vmem:[%s4413_s12 + $0x98] sm:$0xff] }
 0x474   : > { %v3247_v7 = vld [vmem:[%s4413_s12 + $0xd8] sm:$0xff] }
 0x475   : > { %2842 = vmatmul.msk.bf16.vlgmr.msra.gmra.mxu3 %vm1441_vm10, %v1464_v22  ;;  %v2968_v22 = vld [vmem:[%s4410_s5 + $0xb8] sm:$0xf0] }
 0x476   : > { %v2971_v23 = vor.u32 %v3209_v21, %v2968_v22  ;;  %v2886_v21 = vld [vmem:[%s4410_s5 + $0x8] sm:$0xf]  ;;  %v3191_v22 = vld [vmem:[%s4410_s5 + $0x14] sm:$0xf0] }
 0x477   : > { %1875 = vmatpush.bf16.msra.mxu0 %v2967_v20  ;;  %v2883_v20 = vor.u32 %v3188_v17, %v2880_v18 }
 0x478   : > { %1889 = vmatpush.bf16.msra.mxu1 %v2971_v23  ;;  %v3189_v23 = vld [vmem:[%s4410_s5 + $0xc] sm:$0xf] }
 0x479   : > { %v1459_v24 = vpop.xlane.xlu1 %1458 }
 0x47a   : > { %3458 = vrcp.f32 %v1459_v24  ;;  %v2942_v24 = vld [vmem:[%s4410_s5 + $0x80] sm:$0xf] }
 0x480   : > { %v3459_v25 = vpop.eup %3458 }
 0x481   : > { %v1463_v26 = vmul.f32 %v3459_v25, %v3455_v13  ;;  %v3210_v13 = vld [vmem:[%s4410_s5 + $0xac] sm:$0xf0] }
 0x482   : > { %v2959_v15 = vor.u32 %v3210_v13, %v2958_v12  ;;  %v3206_v25 = vld [vmem:[%s4410_s5 + $0x8c] sm:$0xf0]  ;;  %v2904_v12 = vld [vmem:[%s4410_s5 + $0x38] sm:$0xf0]  ;;  %v2878_v13 = vld [vmem:[%s4410_s5] sm:$0xf] }
 0x483   : > { %v1465_v29 = vpack.c.bf16 %v1463_v26, %v1463_v26  ;;  %v3204_v26 = vld [vmem:[%s4410_s5 + $0x84] sm:$0xf]  ;;  %v2879_v19 = vor.u32 %v3190_v16, %v2878_v13  ;;  %v3223_v13 = vld [vmem:[%s4413_s12 + $0x18] sm:$0xff]  ;;  %v3245_v16 = vld [vmem:[%s4413_s12 + $0xc8] sm:$0xff] }
 0x484   : > { %1847 = vmatpush.bf16.msrb.mxu2 %v2959_v15  ;;  %v2907_v15 = vor.u32 %v3193_v11, %v2904_v12  ;;  %v3246_v11 = vld [vmem:[%s4413_s12 + $0xd0] sm:$0xff]  ;;  %v4637_v12 = vld [vmem:[%s4431_s30] sm:$0xf] }
 0x485   : > { %2843 = vmatmul.msk.bf16.vlgmr.msrb.gmra.mxu0 %vm1441_vm10, %v1465_v29  ;;  %v2943_v29 = vor.u32 %v3206_v25, %v2942_v24  ;;  %v2887_v25 = vor.u32 %v3191_v22, %v2886_v21  ;;  %v1679_v17 = vperm.slane %v4637_v12, 2  ;;  %v1680_v18 = vperm.slane %v4637_v12, 3 }
 0x488   : > { %1848 = vmatpush.bf16.msrb.mxu2 %v2943_v29 }
 0x4f8   : > { %v1482_v33 = vpop.f32.mrf.mxu3 }
 0x500   : > { %v1484_v34 = vpop.f32.mrf.mxu3 }
 0x501   : > { %v2951_v34 = vor.u32 %v3207_v32, %v2950_v31 }
 0x502   : > { %v1501_v36 = vpop.f32.mrf.mxu0 }
 0x503   : > { %v1505_v37 = vpack.c.bf16 %v1501_v36, %v1482_v33  ;;  %v2947_v33 = vor.u32 %v3204_v26, %v2944_v30  ;;  %v3205_v36 = vld [vmem:[%s4410_s5 + $0x8c] sm:$0xf]  ;;  %1876 = vmatpush.bf16.msra.mxu0 %v2951_v34  ;;  %v2888_v26 = vld [vmem:[%s4410_s5 + $0x18] sm:$0xf0] }
 0x504   : > { %v2891_v29 = vor.u32 %v3189_v23, %v2888_v26  ;;  %v3236_v23 = vld [vmem:[%s4413_s12 + $0x80] sm:$0xff] }
 0x505   : > { %1582 = vmatmul.bf16.vlgmr.msrb.gmra.mxu1 %v1505_v37  ;;  %v2952_v37 = vld [vmem:[%s4410_s5 + $0x98] sm:$0xf0]  ;;  %1862 = vmatpush.bf16.msrb.mxu3 %v2947_v33 }
 0x50a   : > { %v1503_v38 = vpop.f32.mrf.mxu0 }
 0x50b   : > { %v2955_v38 = vor.u32 %v3205_v36, %v2952_v37 }
 0x50d   : > { %1890 = vmatpush.bf16.msra.mxu1 %v2955_v38 }
 0x582   : > { %v1583_v40 = vpop.f32.mrf.mxu1 }
 0x583   : > { %v1584_v41 = vadd.f32 %v3442_v39, %v1583_v40  ;;  %v3202_v40 = vld [vmem:[%s4410_s5 + $0x6c] sm:$0xf0] }
 0x585   : > { %v4525_v43 = vadd.f32 %v1584_v41, %v4449_v27  ;;  %v3200_v41 = vld [vmem:[%s4410_s5 + $0x64] sm:$0xf] }
 0x587   : > { %1592 = vadd.xlane.f32.xlu2 %v4525_v43 }
 0x58a   : > { %v1585_v42 = vpop.f32.mrf.mxu1 }
 0x58b   : > { %v1586_v44 = vadd.f32 %v3442_v39, %v1585_v42  ;;  %v2926_v39 = vld [vmem:[%s4410_s5 + $0x60] sm:$0xf] }
 0x58c   : > { %v2927_v42 = vor.u32 %v3202_v40, %v2926_v39 }
 0x58d   : > { %v4529_v45 = vadd.f32 %v1586_v44, %v4453_v28  ;;  %v2928_v44 = vld [vmem:[%s4410_s5 + $0x70] sm:$0xf0] }
 0x58e   : > { %1849 = vmatpush.bf16.msrb.mxu2 %v2927_v42 }
 0x58f   : > { %1594 = vadd.xlane.f32.xlu0 %v4529_v45 }
 0x592   : > { %1850 = vmatpush.bf16.msrb.mxu2 %v2911_v56 }
 0x596   : > { %1851 = vmatpush.bf16.msrb.mxu2 %v2895_v4  ;;  %v3225_v4 = vld [vmem:[%s4413_s12 + $0x28] sm:$0xff] }
 0x59a   : > { %1852 = vmatpush.bf16.msrb.mxu2 %v2879_v19  ;;  %v3222_v19 = vld [vmem:[%s4413_s12 + $0x10] sm:$0xff] }
 0x5fa   : > { %v1593_v46 = vpop.xlane.xlu2 %1592 }
 0x5fb   : > { %v1596_v47 = vmul.f32 %v1593_v46, %v4456_v35  ;;  %v2934_v46 = vld [vmem:[%s4410_s5 + $0x68] sm:$0xf] }
 0x5fd   : > { %v4534_v27 = vsub.f32 %v4525_v43, %v1596_v47  ;;  %v3203_v47 = vld [vmem:[%s4410_s5 + $0x74] sm:$0xf0] }
 0x5ff   : > { %v1600_v48 = vmul.f32 %v4534_v27, %v4534_v27 }
 0x601   : > { %1602 = vadd.xlane.f32.xlu1 %v1600_v48  ;;  %v2931_v48 = vor.u32 %v3200_v41, %v2928_v44 }
 0x602   : > { %v1595_v49 = vpop.xlane.xlu0 %1594 }
 0x603   : > { %v1597_v28 = vmul.f32 %v1595_v49, %v4456_v35  ;;  %v2935_v49 = vor.u32 %v3203_v47, %v2934_v46  ;;  %1863 = vmatpush.bf16.msrb.mxu3 %v2931_v48  ;;  %v3443_v48 = vld [vmem:[%s4858_s23] ss:$0 sm:$0xff] }
 0x605   : > { %v4540_v50 = vsub.f32 %v4529_v45, %v1597_v28  ;;  %v3201_v28 = vld [vmem:[%s4410_s5 + $0x6c] sm:$0xf]  ;;  %1877 = vmatpush.bf16.msra.mxu0 %v2935_v49 }
 0x607   : > { %v1601_v51 = vmul.f32 %v4540_v50, %v4540_v50  ;;  %1864 = vmatpush.bf16.msrb.mxu3 %v2915_v60  ;;  %v3227_v60 = vld [vmem:[%s4413_s12 + $0x38] sm:$0xff] }
 0x608   : > { %2237 = vmatpush.bf16.msra.mxu2 %v3227_v60 }
 0x609   : > { %1604 = vadd.xlane.f32.xlu2 %v1601_v51  ;;  %v2936_v51 = vld [vmem:[%s4410_s5 + $0x78] sm:$0xf0]  ;;  %1878 = vmatpush.bf16.msra.mxu0 %v2919_v61 }
 0x60a   : > { %v2939_v52 = vor.u32 %v3201_v28, %v2936_v51  ;;  %v3235_v61 = vld [vmem:[%s4413_s12 + $0x78] sm:$0xff] }
 0x60b   : > { %1865 = vmatpush.bf16.msrb.mxu3 %v2899_v9  ;;  %v3232_v9 = vld [vmem:[%s4413_s12 + $0x60] sm:$0xff] }
 0x60c   : > { %1891 = vmatpush.bf16.msra.mxu1 %v2939_v52 }
 0x60d   : > { %1879 = vmatpush.bf16.msra.mxu0 %v2903_v10  ;;  %v3238_v10 = vld [vmem:[%s4413_s12 + $0x90] sm:$0xff] }
 0x60f   : > { %1866 = vmatpush.bf16.msrb.mxu3 %v2883_v20  ;;  %v3230_v20 = vld [vmem:[%s4413_s12 + $0x50] sm:$0xff] }
 0x610   : > { %1892 = vmatpush.bf16.msra.mxu1 %v2923_v0  ;;  %v3226_v0 = vld [vmem:[%s4413_s12 + $0x30] sm:$0xff] }
 0x611   : > { %1880 = vmatpush.bf16.msra.mxu0 %v2887_v25  ;;  %2238 = vmatpush.bf16.msra.mxu2 %v3226_v0 }
 0x613   : > { %2251 = vmatpush.bf16.msra.mxu3 %v3235_v61 }
 0x614   : > { %1893 = vmatpush.bf16.msra.mxu1 %v2907_v15  ;;  %v3237_v15 = vld [vmem:[%s4413_s12 + $0x88] sm:$0xff] }
 0x615   : > { %2265 = vmatpush.bf16.msrb.mxu0 %v3243_v57  ;;  %2239 = vmatpush.bf16.msra.mxu2 %v3225_v4 }
 0x617   : > { %2252 = vmatpush.bf16.msra.mxu3 %v3234_v1 }
 0x618   : > { %1894 = vmatpush.bf16.msra.mxu1 %v2891_v29  ;;  %v1677_v29 = vperm.slane %v4637_v12, 0 }
 0x61b   : > { %2253 = vmatpush.bf16.msra.mxu3 %v3233_v5 }
 0x61c   : > { %2279 = vmatpush.bf16.msrb.mxu1 %v3251_v58 }
 0x61f   : > { %2254 = vmatpush.bf16.msra.mxu3 %v3232_v9 }
 0x620   : > { %2280 = vmatpush.bf16.msrb.mxu1 %v3250_v59 }
 0x624   : > { %2281 = vmatpush.bf16.msrb.mxu1 %v3249_v63 }
 0x628   : > { %2282 = vmatpush.bf16.msrb.mxu1 %v3248_v3 }
 0x62c   : > { %2283 = vmatpush.bf16.msrb.mxu1 %v3247_v7 }
 0x630   : > { %2284 = vmatpush.bf16.msrb.mxu1 %v3246_v11 }
 0x634   : > { %2285 = vmatpush.bf16.msrb.mxu1 %v3245_v16 }
 0x674   : > { %v1603_v8 = vpop.xlane.xlu1 %1602 }
 0x675   : > { %v1606_v14 = vmul.f32 %v1603_v8, %v4456_v35  ;;  %v3224_v8 = vld [vmem:[%s4413_s12 + $0x20] sm:$0xff] }
 0x676   : > { %2240 = vmatpush.bf16.msra.mxu2 %v3224_v8 }
 0x677   : > { %v1608_v24 = vadd.f32 1e-05, %v1606_v14  ;;  %v3231_v14 = vld [vmem:[%s4413_s12 + $0x58] sm:$0xff] }
 0x678   : > { %2255 = vmatpush.bf16.msra.mxu3 %v3231_v14 }
 0x679   : > { %3460 = vrsqrt.f32 %v1608_v24  ;;  %vm1616_vm12 = vweird.f32 %v1608_v24 }
 0x67a   : > { %2241 = vmatpush.bf16.msra.mxu2 %v3223_v13 }
 0x67c   : > { %v1605_v30 = vpop.xlane.xlu2 %1604  ;;  %2256 = vmatpush.bf16.msra.mxu3 %v3230_v20 }
 0x67d   : > { %v1607_v31 = vmul.f32 %v1605_v30, %v4456_v35  ;;  %v1678_v30 = vperm.slane %v4637_v12, 1 }
 0x67e   : > { %2242 = vmatpush.bf16.msra.mxu2 %v3222_v19 }
 0x67f   : > { %v3461_v32 = vpop.eup %3460  ;;  %v1609_v33 = vadd.f32 1e-05, %v1607_v31  ;;  %v3221_v31 = vld [vmem:[%s4413_s12 + $0x8] sm:$0xff] }
 0x680   : > { %v1611_v34 = vmul.f32 %v3461_v32, %v1608_v24  ;;  %vm1617_vm11 = vweird.f32 %v3461_v32  ;;  %v3244_v24 = vld [vmem:[%s4413_s12 + $0xc0] sm:$0xff] }
 0x681   : > { %3462 = vrsqrt.f32 %v1609_v33  ;;  %vm1618_vm13 = vmor %vm1616_vm12, %vm1617_vm11  ;;  %vm1626_vm15 = vweird.f32 %v1609_v33  ;;  %2286 = vmatpush.bf16.msrb.mxu1 %v3244_v24 }
 0x682   : > { %v1612_v36 = vmul.f32 %v3461_v32, %v1611_v34  ;;  %2243 = vmatpush.bf16.msra.mxu2 %v3221_v31 }
 0x684   : > { %v1613_v37 = vmul.f32 0.5, %v1612_v36 }
 0x686   : > { %v1614_v38 = vsub.f32 1.5, %v1613_v37 }
 0x687   : > { %v3463_v39 = vpop.eup %3462 }
 0x688   : > { %v1615_v40 = vmul.f32 %v3461_v32, %v1614_v38  ;;  %v1621_v41 = vmul.f32 %v3463_v39, %v1609_v33  ;;  %vm1627_vm14 = vweird.f32 %v3463_v39 }
 0x689   : > { %vm1628_vm0 = vmor %vm1626_vm15, %vm1627_vm14 }
 0x68a   : > { %v1622_v42 = vmul.f32 %v3463_v39, %v1621_v41  ;;  %v1619_v44 = vsel %vm1618_vm13, %v3461_v32, %v1615_v40  ;;  %v3229_v32 = vld [vmem:[%s4413_s12 + $0x48] sm:$0xff] }
 0x68b   : > { %v1630_v35 = vmul.f32 %v1619_v44, %v4534_v27  ;;  %2257 = vmatpush.bf16.msra.mxu3 %v3229_v32  ;;  %v3228_v44 = vld [vmem:[%s4413_s12 + $0x40] sm:$0xff] }
 0x68c   : > { %v1623_v46 = vmul.f32 0.5, %v1622_v42  ;;  %v3220_v42 = vld [vmem:[%s4413_s12] sm:$0xff] }
 0x68d   : > { %v1635_v52 = vmul.f32 %v3443_v48, %v1630_v35  ;;  %2244 = vmatpush.bf16.msra.mxu2 %v3220_v42 }
 0x68e   : > { %v1624_v47 = vsub.f32 1.5, %v1623_v46 }
 0x68f   : > { %v1640_v55 = vadd.f32 %v3444_v53, %v1635_v52  ;;  %2258 = vmatpush.bf16.msra.mxu3 %v3228_v44 }
 0x690   : > { %v1625_v49 = vmul.f32 %v3463_v39, %v1624_v47 }
 0x692   : > { %v1629_v28 = vsel %vm1628_vm0, %v3463_v39, %v1625_v49 }
 0x693   : > { %v1631_v51 = vmul.f32 %v1629_v28, %v4540_v50  ;;  %v3242_v50 = vld [vmem:[%s4413_s12 + $0xb0] sm:$0xff] }
 0x694   : > { %2266 = vmatpush.bf16.msrb.mxu0 %v3242_v50 }
 0x695   : > { %v1636_v54 = vmul.f32 %v3443_v48, %v1631_v51 }
 0x697   : > { %v1641_v27 = vadd.f32 %v3444_v53, %v1636_v54 }
 0x698   : > { %2267 = vmatpush.bf16.msrb.mxu0 %v3241_v62 }
 0x699   : > { %v1642_v56 = vpack.c.bf16 %v1641_v27, %v1640_v55 }
 0x69b   : > { %1853 = vmatmul.bf16.vlgmr.msrb.gmra.mxu2 %v1642_v56  ;;  %1867 = vmatmul.bf16.vlgmr.msrb.gmra.mxu3 %v1642_v56 }
 0x69c   : > { %1881 = vmatmul.bf16.vlgmr.msra.gmra.mxu0 %v1642_v56  ;;  %1895 = vmatmul.bf16.vlgmr.msra.gmra.mxu1 %v1642_v56 }
 0x69d   : > { %2268 = vmatpush.bf16.msrb.mxu0 %v3240_v2 }
 0x6a1   : > { %2269 = vmatpush.bf16.msrb.mxu0 %v3239_v6 }
 0x6a5   : > { %2270 = vmatpush.bf16.msrb.mxu0 %v3238_v10 }
 0x6a9   : > { %2271 = vmatpush.bf16.msrb.mxu0 %v3237_v15 }
 0x6ad   : > { %2272 = vmatpush.bf16.msrb.mxu0 %v3236_v23 }
 0x719   : > { %v1882_v21 = vpop.f32.mrf.mxu0  ;;  %v1896_v22 = vpop.f32.mrf.mxu1 }
 0x71a   : > { %v4649_v25 = vadd.f32 %v1882_v21, %v1679_v17  ;;  %v4651_v26 = vadd.f32 %v1896_v22, %v1680_v18 }
 0x71c   : > { %v1903_v33 = vmul.f32 %v4649_v25, %v4649_v25  ;;  %v1904_v34 = vmul.f32 %v4651_v26, %v4651_v26 }
 0x71e   : > { %v1911_v36 = vmul.f32 %v1903_v33, %v4649_v25  ;;  %v1912_v37 = vmul.f32 %v1904_v34, %v4651_v26  ;;  %v1854_v38 = vpop.f32.mrf.mxu2  ;;  %v1868_v39 = vpop.f32.mrf.mxu3 }
 0x71f   : > { %v4663_v40 = vadd.f32 %v1854_v38, %v1677_v29  ;;  %v4665_v41 = vadd.f32 %v1868_v39, %v1678_v30 }
 0x720   : > { %v1919_v46 = vmul.f32 0.044715, %v1911_v36  ;;  %v1920_v47 = vmul.f32 0.044715, %v1912_v37 }
 0x721   : > { %v1901_v35 = vmul.f32 %v4663_v40, %v4663_v40  ;;  %v1902_v48 = vmul.f32 %v4665_v41, %v4665_v41  ;;  %v1884_v49 = vpop.f32.mrf.mxu0  ;;  %v1898_v28 = vpop.f32.mrf.mxu1 }
 0x722   : > { %v1927_v51 = vadd.f32 %v1919_v46, %v4649_v25  ;;  %v1928_v52 = vadd.f32 %v1920_v47, %v4651_v26  ;;  %v1885_v53 = vadd.f32 %v1884_v49, %v1679_v17  ;;  %v4675_v54 = vadd.f32 %v1898_v28, %v1680_v18 }
 0x723   : > { %v1909_v55 = vmul.f32 %v1901_v35, %v4663_v40  ;;  %v1910_v27 = vmul.f32 %v1902_v48, %v4665_v41 }
 0x724   : > { %v1935_v56 = vmul.f32 0.7978846, %v1927_v51  ;;  %v1907_v57 = vmul.f32 %v1885_v53, %v1885_v53  ;;  %v1908_v58 = vmul.f32 %v4675_v54, %v4675_v54  ;;  %v1936_v50 = vmul.f32 0.7978846, %v1928_v52 }
 0x725   : > { %v1917_v59 = vmul.f32 0.044715, %v1909_v55  ;;  %v1918_v60 = vmul.f32 0.044715, %v1910_v27 }
 0x726   : > { %v1915_v61 = vmul.f32 %v1907_v57, %v1885_v53  ;;  %v1916_v62 = vmul.f32 %v1908_v58, %v4675_v54  ;;  %v1856_v63 = vpop.f32.mrf.mxu2  ;;  %v1870_v0 = vpop.f32.mrf.mxu3  ;;  %3464 = vtanh.f32 %v1935_v56 }
 0x727   : > { %v1925_v1 = vadd.f32 %v1917_v59, %v4663_v40  ;;  %v1926_v2 = vadd.f32 %v1918_v60, %v4665_v41  ;;  %v1857_v3 = vadd.f32 %v1856_v63, %v1677_v29  ;;  %v1871_v6 = vadd.f32 %v1870_v0, %v1678_v30 }
 0x728   : > { %v1923_v4 = vmul.f32 0.044715, %v1915_v61  ;;  %v1924_v5 = vmul.f32 0.044715, %v1916_v62  ;;  %3466 = vtanh.f32 %v1936_v50 }
 0x729   : > { %v1933_v7 = vmul.f32 0.7978846, %v1925_v1  ;;  %v1934_v8 = vmul.f32 0.7978846, %v1926_v2  ;;  %v1905_v9 = vmul.f32 %v1857_v3, %v1857_v3  ;;  %v1906_v12 = vmul.f32 %v1871_v6, %v1871_v6 }
 0x72a   : > { %v1931_v10 = vadd.f32 %v1923_v4, %v1885_v53  ;;  %v1932_v11 = vadd.f32 %v1924_v5, %v4675_v54 }
 0x72b   : > { %v1913_v13 = vmul.f32 %v1905_v9, %v1857_v3  ;;  %3468 = vtanh.f32 %v1933_v7  ;;  %v1914_v16 = vmul.f32 %v1906_v12, %v1871_v6 }
 0x72c   : > { %v1939_v14 = vmul.f32 0.7978846, %v1931_v10  ;;  %v1940_v15 = vmul.f32 0.7978846, %v1932_v11  ;;  %3470 = vtanh.f32 %v1934_v8  ;;  %v3465_v18 = vpop.eup %3464 }
 0x72d   : > { %v1921_v17 = vmul.f32 0.044715, %v1913_v13  ;;  %v1922_v19 = vmul.f32 0.044715, %v1914_v16  ;;  %v1951_v23 = vadd.f32 1.0, %v3465_v18 }
 0x72e   : > { %3472 = vtanh.f32 %v1939_v14  ;;  %v3467_v20 = vpop.eup %3466 }
 0x72f   : > { %3474 = vtanh.f32 %v1940_v15  ;;  %v1929_v21 = vadd.f32 %v1921_v17, %v1857_v3  ;;  %v1930_v22 = vadd.f32 %v1922_v19, %v1871_v6  ;;  %v1952_v30 = vadd.f32 1.0, %v3467_v20 }
 0x730   : > { %v1959_v36 = vmul.f32 0.5, %v1951_v23 }
 0x731   : > { %v1937_v24 = vmul.f32 0.7978846, %v1929_v21  ;;  %v3469_v29 = vpop.eup %3468  ;;  %v1938_v31 = vmul.f32 0.7978846, %v1930_v22  ;;  %v1960_v38 = vmul.f32 0.5, %v1952_v30 }
 0x732   : > { %v3471_v32 = vpop.eup %3470  ;;  %v1949_v39 = vadd.f32 1.0, %v3469_v29  ;;  %v1967_v48 = vmul.f32 %v1959_v36, %v4649_v25 }
 0x733   : > { %3476 = vtanh.f32 %v1937_v24  ;;  %v1950_v44 = vadd.f32 1.0, %v3471_v32  ;;  %v1968_v51 = vmul.f32 %v1960_v38, %v4651_v26 }
 0x734   : > { %v3473_v33 = vpop.eup %3472  ;;  %3478 = vtanh.f32 %v1938_v31  ;;  %v1957_v52 = vmul.f32 0.5, %v1949_v39 }
 0x735   : > { %v3475_v34 = vpop.eup %3474  ;;  %v1955_v37 = vadd.f32 1.0, %v3473_v33  ;;  %v1958_v56 = vmul.f32 0.5, %v1950_v44 }
 0x736   : > { %v1956_v42 = vadd.f32 1.0, %v3475_v34  ;;  %v1965_v61 = vmul.f32 %v1957_v52, %v4663_v40 }
 0x737   : > { %v1963_v46 = vmul.f32 0.5, %v1955_v37  ;;  %v1966_v25 = vmul.f32 %v1958_v56, %v4665_v41 }
 0x738   : > { %v1964_v47 = vmul.f32 0.5, %v1956_v42 }
 0x739   : > { %v3477_v35 = vpop.eup %3476  ;;  %v1971_v49 = vmul.f32 %v1963_v46, %v1885_v53 }
 0x73a   : > { %v3479_v28 = vpop.eup %3478  ;;  %v1972_v55 = vmul.f32 %v1964_v47, %v4675_v54  ;;  %v1953_v27 = vadd.f32 1.0, %v3477_v35  ;;  %v3445_v54 = vld [vmem:[%s941_s0] ss:$0 sm:$0xff]  ;;  %s4862_s0 = sld [smem:[#allocation59_spill]] }
 0x73b   : > { %v1954_v57 = vadd.f32 1.0, %v3479_v28  ;;  %v1975_v58 = vpack.c.bf16 %v1971_v49, %v1967_v48 }
 0x73c   : > { %v1961_v50 = vmul.f32 0.5, %v1953_v27  ;;  %v1976_v59 = vpack.c.bf16 %v1972_v55, %v1968_v51 }
 0x73d   : > { %v1962_v60 = vmul.f32 0.5, %v1954_v57  ;;  %2273 = vmatmul.bf16.vlgmr.msrb.gmra.mxu0 %v1975_v58 }
 0x73e   : > { %v1969_v62 = vmul.f32 %v1961_v50, %v1857_v3  ;;  %2287 = vmatmul.bf16.vlgmr.msrb.gmra.mxu1 %v1976_v59 }
 0x73f   : > { %v1970_v26 = vmul.f32 %v1962_v60, %v1871_v6 }
 0x740   : > { %v1973_v53 = vpack.c.bf16 %v1969_v62, %v1965_v61  ;;  %s2309_s14 = scalar_lea.hbm %s4862_s0, %s3252_s9  ;;  %s3860_s20 = scalar_lea.hbm %s4862_s0, 32 }
 0x741   : > { %v1974_v63 = vpack.c.bf16 %v1970_v26, %v1966_v25  ;;  %s2312_s2 = sshll.u32 %s2309_s14, 4  ;;  %s2313_s2 = int_to_ptr.hbm [resolvable:$true] %s2312_s2 }
 0x742   : > { %2245 = vmatmul.bf16.vlgmr.msra.gmra.mxu2 %v1973_v53  ;;  %s3854_s29 = sshra.s32 %s2313_s2, 4  ;;  %s3855_s29 = int_to_ptr.hbm [resolvable:$true] %s3854_s29 }
 0x743   : > { %2259 = vmatmul.bf16.vlgmr.msra.gmra.mxu3 %v1974_v63  ;;  %s3856_s3 = scalar_lea.hbm %s3855_s29, 16  ;;  %p3861_p6 = scmp.lt.s32.totalorder %s3855_s29, %s4862_s0 }
 0x744   : > { %p3857_p13 = scmp.ne.s32.totalorder %s3855_s29, %s3856_s3  ;;  %p3862_p8 = scmp.lt.s32.totalorder %s3860_s20, %s3856_s3 }
 0x746   : > { %p3858_p3 = pnand %p3857_p13, %p4282_p0  ;;  %p3863_p11 = por %p3862_p8, %p3861_p6 }
 0x748   : > { %p3859_p5 = pneg %p3858_p3 }
 0x74a   : > { %p3864_p2 = pnand %p3863_p11, %p3859_p5 }
 0x7ba   : > { %v2274_v40 = vpop.f32.mrf.mxu0 }
 0x7bb   : > { %v2288_v4 = vpop.f32.mrf.mxu1 }
 0x7c2   : > { %v2276_v11 = vpop.f32.mrf.mxu0 }
 0x7c3   : > { %v2290_v13 = vpop.f32.mrf.mxu1 }
 0x7c5   : > { %v2246_v0 = vpop.f32.mrf.mxu2 }
 0x7c6   : > { %v2247_v1 = vadd.f32 %v3445_v54, %v2246_v0  ;;  %v2260_v2 = vpop.f32.mrf.mxu3 }
 0x7c8   : > { %v2261_v3 = vadd.f32 %v2260_v2, %v2247_v1 }
 0x7ca   : > { %v2275_v5 = vadd.f32 %v2274_v40, %v2261_v3 }
 0x7cc   : > { %v2289_v41 = vadd.f32 %v2288_v4, %v2275_v5 }
 0x7cd   : > { %v2248_v6 = vpop.f32.mrf.mxu2 }
 0x7ce   : > { %v2293_v7 = vadd.f32 %v2289_v41, %v4525_v43  ;;  %v2249_v8 = vadd.f32 %v3445_v54, %v2248_v6  ;;  %v2262_v9 = vpop.f32.mrf.mxu3 }
 0x7d0   : > { %2295 = vst [vmem:[%s4439_s4] sm:$0xff] %v2293_v7  ;;  %v2263_v10 = vadd.f32 %v2262_v9, %v2249_v8 }
 0x7d2   : > { %v2277_v12 = vadd.f32 %v2276_v11, %v2263_v10 }
 0x7d4   : > { %v2291_v14 = vadd.f32 %v2290_v13, %v2277_v12 }
 0x7d6   : > { %v2294_v43 = vadd.f32 %v2291_v14, %v4529_v45 }
 0x7d8   : > { %2296 = vst [vmem:[%s4439_s4 + $0x8] sm:$0xff] %v2294_v43 }
 0x7d9   : > { %3867 = shalt.err (!%p3864_p2)
}
 0x7da   : > { %s3998_s1 = smov 128   ;;  %s3999_s4 = smov 8  }
 0x7db   : > { %3287 = dma.vmem_to_hbm [thread:$0]  (%p4282_p0), %s2311_s13, 256, %s2313_s2, %s2298_s19, %s3998_s1, %s3998_s1, %s3999_s4  }
 0x7dc PF: > { %p3336_p1 = scmp.ge.s32.totalorder %s3986_s28, 2  ;;  %s2327_s25 = sand.u32 1, %s3958_s21  }
 0x7dd   : > { %s2328_s27 = scalar_lea.sflag [#allocation4], %s2327_s25 }
 0x7de   : > { %p3328_p4 = pnand %p3336_p1, %p4294_p10 }
 0x7e0   : > { %p3329_p9 = pneg %p3328_p4 }
 0x7e2   : > { %3941 = dma.done.wait (%p3329_p9), %s2328_s27, 256  }
 0x7e3   : > { %3943 = vsyncadd (%p3329_p9), %s2328_s27, 4294967040  ;;  %s47_s28 = sadd.s32 1, %s3986_s28   ;;  %s4863_s18 = sld [smem:[#allocation31_spill]] }
 0x7e4   : > { %p44_p12 = scmp.ge.s32.totalorder %s47_s28, 6   ;;  %s4864_s19 = sld [smem:[#allocation32_spill]] }
 0x7e5   : > { %s4865_s20 = sld [smem:[#allocation42_spill]]  ;;  %s4872_s21 = smov %s3962_s22 }
 0x7e6   : > { %s4866_s8 = sld [smem:[#allocation33_spill]] }
 0x7e7   : > { %s4867_s23 = sld [smem:[#allocation43_spill]] }
 0x7e8   : > { %s4868_s24 = sld [smem:[#allocation36_spill]]  ;;  %46 = sbr.rel (!%p44_p12) target bundleno = 37 (0x25), region = 259 }
 0x7e9   : > { %s4869_s25 = sld [smem:[#allocation37_spill]] }
 0x7ea   : > { %s4870_s26 = sld [smem:[#allocation40_spill]] }
 0x7eb   : > { %s4871_s27 = sld [smem:[#allocation41_spill]] }
 0x7ec   : > { %s4873_s22 = smov %s4866_s8 }
 0x7ed   :  { %2334 = vsyncpa [#allocation3], 1 }
 0x7ee   :  { %2336 = vsyncpa [#allocation3 + $0x1], 1 }
 0x7ef   :  { %2337 = vsyncpa [#allocation6], 1 }
 0x7f0   :  { %2338 = vsyncpa [#allocation9], 1 }
 0x7f1   :  { %2340 = vsyncpa [#allocation9 + $0x1], 1 }
 0x7f2   :  { %2341 = vsyncpa [#allocation12], 1 }
 0x7f3   :  { %2343 = vsyncpa [#allocation12 + $0x1], 1 }
 0x7f4   :  { %2344 = vsyncpa [#allocation15], 1 }
 0x7f5   :  { %2346 = vsyncpa [#allocation15 + $0x1], 1 }
 0x7f6   :  { %2347 = vsyncpa [#allocation18], 1 }
 0x7f7   :  { %2349 = vsyncpa [#allocation18 + $0x1], 1 }
 0x7f8   :  { %2350 = vsyncpa [#allocation21], 1 }
 0x7f9   :  { %2352 = vsyncpa [#allocation21 + $0x1], 1 }
 0x7fa   :  { %2353 = vsyncpa [#allocation4], 1 }
 0x7fb   :  { %2355 = vsyncpa [#allocation4 + $0x1], 1 }

</bundles_post_ra>
